<compile_context>
chip_gen: v6e
topology: v6e:2x2x1
jax: 0.10.0
libtpu: 0.0.40
codegen_flags: <defaults>
</compile_context>

<pallas_src>
import jax
import jax.numpy as jnp
import numpy as np
from jax.experimental import pallas as pl
from jax.experimental.pallas import tpu as pltpu


# ----------------------------------------------------------------------------
# Activation specs (mirror of `activation_funcs` in the PyTorch source).
# ----------------------------------------------------------------------------
_ACT_SPECS = {
    "linear":   dict(fn=lambda x, a: x,                           def_alpha=0.0, def_gain=1.0),
    "relu":     dict(fn=lambda x, a: jnp.maximum(x, 0.0),         def_alpha=0.0, def_gain=float(np.sqrt(2))),
    "lrelu":    dict(fn=lambda x, a: jnp.where(x >= 0, x, x * a), def_alpha=0.2, def_gain=float(np.sqrt(2))),
    "tanh":     dict(fn=lambda x, a: jnp.tanh(x),                 def_alpha=0.0, def_gain=1.0),
    "sigmoid":  dict(fn=lambda x, a: jax.nn.sigmoid(x),           def_alpha=0.0, def_gain=1.0),
    "elu":      dict(fn=lambda x, a: jax.nn.elu(x),               def_alpha=0.0, def_gain=1.0),
    "selu":     dict(fn=lambda x, a: jax.nn.selu(x),              def_alpha=0.0, def_gain=1.0),
    "softplus": dict(fn=lambda x, a: jax.nn.softplus(x),          def_alpha=0.0, def_gain=1.0),
    "swish":    dict(fn=lambda x, a: jax.nn.sigmoid(x) * x,       def_alpha=0.0, def_gain=float(np.sqrt(2))),
}


def _cdiv(a, b):
    return (a + b - 1) // b


def _round_up(x, m):
    return _cdiv(x, m) * m


def _vmem_cap_bytes():
    try:
        cap = int(pltpu.get_tpu_info().vmem_capacity_bytes)
    except Exception:
        cap = 64 << 20
    return min(int(cap * 0.8), 100 << 20)


# ----------------------------------------------------------------------------
# Fused epilogue: bias + activation + gain + (optional) clamp, all in f32.
# ----------------------------------------------------------------------------
def _make_epilogue(act, alpha, gain, clamp):
    act_fn = _ACT_SPECS[act]["fn"]

    def epilogue(acc, b):
        if b is not None:
            acc = acc + b.astype(jnp.float32)      # (1, tn) broadcasts over rows
        acc = act_fn(acc, alpha)
        if gain != 1.0:
            acc = acc * jnp.float32(gain)
        if clamp is not None and clamp >= 0:
            acc = jnp.clip(acc, -float(clamp), float(clamp))
        return acc

    return epilogue


# ----------------------------------------------------------------------------
# Kernel (common case): whole K reduced in one dot, no accumulator.
# ----------------------------------------------------------------------------
def _make_kernel_single(act, alpha, gain, clamp, has_bias, compute_dtype):
    epi = _make_epilogue(act, alpha, gain, clamp)
    cdt = jnp.dtype(compute_dtype)

    def kernel(*refs):
        if has_bias:
            x_ref, w_ref, b_ref, o_ref = refs
        else:
            x_ref, w_ref, o_ref = refs
            b_ref = None
        x = x_ref[...]
        if x.dtype != cdt:                        # in-kernel cast (free VPU work)
            x = x.astype(cdt)
        acc = jnp.dot(x, w_ref[...], preferred_element_type=jnp.float32)
        acc = epi(acc, b_ref[...] if b_ref is not None else None)
        o_ref[...] = acc.astype(o_ref.dtype)

    return kernel


# ----------------------------------------------------------------------------
# Kernel (rare case, K > k_single_max): K tiled along trailing "arbitrary" axis.
# f32 outputs accumulate directly into o_ref; otherwise a VMEM f32 scratch.
# ----------------------------------------------------------------------------
def _make_kernel_ktiled(act, alpha, gain, clamp, has_bias, compute_dtype, acc_in_out):
    epi = _make_epilogue(act, alpha, gain, clamp)
    cdt = jnp.dtype(compute_dtype)

    def kernel(*refs):
        if has_bias:
            if acc_in_out:
                x_ref, w_ref, b_ref, o_ref = refs
                acc_ref = o_ref
            else:
                x_ref, w_ref, b_ref, o_ref, acc_ref = refs
        else:
            if acc_in_out:
                x_ref, w_ref, o_ref = refs
                acc_ref = o_ref
            else:
                x_ref, w_ref, o_ref, acc_ref = refs
            b_ref = None

        k = pl.program_id(2)

        @pl.when(k == 0)
        def _():
            acc_ref[...] = jnp.zeros_like(acc_ref)

        x = x_ref[...]
        if x.dtype != cdt:
            x = x.astype(cdt)
        acc_ref[...] += jnp.dot(x, w_ref[...], preferred_element_type=jnp.float32)

        @pl.when(k == pl.num_programs(2) - 1)
        def _():
            acc = acc_ref[...].astype(jnp.float32)
            acc = epi(acc, b_ref[...] if b_ref is not None else None)
            o_ref[...] = acc.astype(o_ref.dtype)

    return kernel


# ----------------------------------------------------------------------------
# Pallas dispatch for a 2-D problem.
# ----------------------------------------------------------------------------
def _fc_forward_2d(x2d, w_t, bias_row, *, act, alpha, gain, clamp, out_dtype,
                   compute_dtype, k_tiled, tm, tn, tk, w_resident_max_bytes):
    """x2d: (M, Kp) native dtype, w_t: (Kp, Np) pre-scaled compute-dtype weight,
    bias_row: (1, Np) f32 or None. Returns (M, Np)."""
    M, Kx = x2d.shape
    Kp, Np = w_t.shape
    assert Kx == Kp
    has_bias = bias_row is not None

    cd_item = jnp.dtype(compute_dtype).itemsize
    x_item = jnp.dtype(x2d.dtype).itemsize
    out_item = jnp.dtype(out_dtype).itemsize

    tm_eff = min(tm, M)

    if not k_tiled:
        # ---- common fast path: no K axis, no accumulator ----
        if Kp * Np * cd_item <= w_resident_max_bytes:
            tn_eff = Np                     # whole W resident -> x and W single-pass
        else:
            tn_eff = min(tn, Np)
        n_j = _cdiv(Np, tn_eff)
        # v7x has 2 TensorCores: guarantee >= 2 parallel blocks when possible.
        if n_j * _cdiv(M, tm_eff) < 2 and M > 8:
            tm_eff = min(tm_eff, _round_up(_cdiv(M, 2), 8))
        n_i = _cdiv(M, tm_eff)
        grid = (n_i, n_j)

        kernel = _make_kernel_single(act, alpha, gain, clamp, has_bias, compute_dtype)
        in_specs = [
            pl.BlockSpec((tm_eff, Kp), lambda i, j: (i, 0)),
            pl.BlockSpec((Kp, tn_eff), lambda i, j: (0, j)),   # constant in i -> W DMA'd once per column block
        ]
        inputs = [x2d, w_t]
        if has_bias:
            in_specs.append(pl.BlockSpec((1, tn_eff), lambda i, j: (0, j)))
            inputs.append(bias_row)
        out_spec = pl.BlockSpec((tm_eff, tn_eff), lambda i, j: (i, j))
        scratch = []
        semantics = ("parallel", "parallel")
        est = (2 * tm_eff * Kp * x_item
               + 2 * Kp * tn_eff * cd_item
               + (2 * tn_eff * 4 if has_bias else 0)
               + 2 * tm_eff * tn_eff * out_item)
    else:
        # ---- rare path: K tiled as trailing "arbitrary" axis ----
        tn_eff = min(tn, Np)
        tk_eff = min(tk, Kp)
        assert Kp % tk_eff == 0
        n_j = _cdiv(Np, tn_eff)
        if n_j * _cdiv(M, tm_eff) < 2 and M > 8:
            tm_eff = min(tm_eff, _round_up(_cdiv(M, 2), 8))
        n_i = _cdiv(M, tm_eff)
        grid = (n_i, n_j, Kp // tk_eff)

        acc_in_out = jnp.dtype(out_dtype) == jnp.dtype(jnp.float32)
        kernel = _make_kernel_ktiled(act, alpha, gain, clamp, has_bias,
                                     compute_dtype, acc_in_out)
        in_specs = [
            pl.BlockSpec((tm_eff, tk_eff), lambda i, j, k: (i, k)),
            pl.BlockSpec((tk_eff, tn_eff), lambda i, j, k: (k, j)),
        ]
        inputs = [x2d, w_t]
        if has_bias:
            in_specs.append(pl.BlockSpec((1, tn_eff), lambda i, j, k: (0, j)))
            inputs.append(bias_row)
        out_spec = pl.BlockSpec((tm_eff, tn_eff), lambda i, j, k: (i, j))
        scratch = [] if acc_in_out else [pltpu.VMEM((tm_eff, tn_eff), jnp.float32)]
        semantics = ("parallel", "parallel", "arbitrary")
        est = (2 * tm_eff * tk_eff * x_item
               + 2 * tk_eff * tn_eff * cd_item
               + (2 * tn_eff * 4 if has_bias else 0)
               + 2 * tm_eff * tn_eff * out_item
               + (0 if acc_in_out else tm_eff * tn_eff * 4))

    vmem_limit = int(min(2 * est + (8 << 20), _vmem_cap_bytes()))

    return pl.pallas_call(
        kernel,
        out_shape=jax.ShapeDtypeStruct((M, Np), out_dtype),
        grid_spec=pltpu.PrefetchScalarGridSpec(
            num_scalar_prefetch=0,
            grid=grid,
            in_specs=in_specs,
            out_specs=out_spec,
            scratch_shapes=scratch,
        ),
        compiler_params=pltpu.CompilerParams(
            dimension_semantics=semantics,
            vmem_limit_bytes=vmem_limit,
        ),
    )(*inputs)


# ----------------------------------------------------------------------------
# FullyConnectedLayer equivalent (parameters created deterministically).
# ----------------------------------------------------------------------------
class FullyConnectedLayer:
    """JAX/Pallas port of the StyleGAN FullyConnectedLayer forward pass.

    compute_dtype=jnp.bfloat16 is recommended on v5e as well as v6e/v7x (bf16 is
    the native MXU dtype on all three generations and halves x/W DMA bytes);
    accumulation, bias, activation and gain always stay in f32.
    """

    _TM, _TN, _TK = 512, 512, 512      # one tile config for every generation
    _K_SINGLE_MAX = 4096               # reduce whole K in one dot up to this size
    _W_RESIDENT_MAX = 12 << 20         # hold full weight in VMEM below this size
    _SMALL_FLOPS = 1 << 21             # below this, plain XLA beats launch overhead

    def __init__(self, in_features, out_features, *, bias=True, activation="linear",
                 lr_multiplier=1.0, bias_init=0.0, key=None,
                 compute_dtype=jnp.float32, tiles=None,
                 k_single_max=None, w_resident_max_bytes=None):
        if key is None:
            key = jax.random.PRNGKey(0)
        # torch.randn([out, in]) / lr_multiplier
        self.weight = jax.random.normal(key, (out_features, in_features),
                                        dtype=jnp.float32) / lr_multiplier
        self.bias = (jnp.full((out_features,), np.float32(bias_init), dtype=jnp.float32)
                     if bias else None)
        self.activation = activation
        self.weight_gain = float(lr_multiplier / np.sqrt(in_features))
        self.bias_gain = float(lr_multiplier)
        self.in_features = in_features
        self.out_features = out_features
        self.compute_dtype = jnp.dtype(compute_dtype)

        self.tm, self.tn, self.tk = tiles if tiles is not None else (self._TM, self._TN, self._TK)
        self.k_single_max = k_single_max if k_single_max is not None else self._K_SINGLE_MAX
        self.w_resident_max = (w_resident_max_bytes if w_resident_max_bytes is not None
                               else self._W_RESIDENT_MAX)

        # --- One-time parameter prep (NOT per call): scale, transpose, pad. ---
        K, N = in_features, out_features
        self._k_tiled = K > self.k_single_max
        Kp = _round_up(K, self.tk) if self._k_tiled else K
        # Pad N to one full 128-lane register only when N < 128 (lane-dense stores);
        # for N >= 128 the true N is used and Pallas masks only the edge block.
        Np = 128 if N < 128 else N

        w_t = (self.weight * self.weight_gain).T            # (K, N), scaled once
        if (Kp, Np) != (K, N):
            w_t = jnp.pad(w_t, ((0, Kp - K), (0, Np - N)))
        self._w_t = w_t.astype(self.compute_dtype)
        if bias:
            b = self.bias * self.bias_gain if self.bias_gain != 1.0 else self.bias
            b = b.reshape(1, -1)
            if Np != N:
                b = jnp.pad(b, ((0, 0), (0, Np - N)))
            self._bias_row = b.astype(jnp.float32)
        else:
            self._bias_row = None
        self._Kp, self._Np = Kp, Np
        # NOTE: self.weight is kept only so the reference check below can use it;
        # drop it in production to avoid doubling the weight HBM footprint.

    def __call__(self, x):
        orig_shape = x.shape
        out_dtype = x.dtype
        K, N = self.in_features, self.out_features
        x2d = x.reshape(-1, K)                              # (M, K), native dtype
        M = x2d.shape[0]
        spec = _ACT_SPECS[self.activation]
        alpha, gain = spec["def_alpha"], spec["def_gain"]

        if 2 * M * K * N < self._SMALL_FLOPS:
            # Tiny problems: fixed kernel-launch + wrapper overhead dominates.
            xc = x2d.astype(self.compute_dtype) if x2d.dtype != self.compute_dtype else x2d
            acc = jnp.dot(xc, self._w_t[:K], preferred_element_type=jnp.float32)
            if self._bias_row is not None:
                acc = acc + self._bias_row
            acc = spec["fn"](acc, alpha)
            if gain != 1.0:
                acc = acc * jnp.float32(gain)
            out2d = acc.astype(out_dtype)
        else:
            if self._k_tiled and self._Kp != K:             # only the rare K-tiled path pads
                x2d = jnp.pad(x2d, ((0, 0), (0, self._Kp - K)))
            out2d = _fc_forward_2d(
                x2d, self._w_t, self._bias_row,
                act=self.activation, alpha=alpha, gain=gain, clamp=None,
                out_dtype=out_dtype, compute_dtype=self.compute_dtype,
                k_tiled=self._k_tiled, tm=self.tm, tn=self.tn, tk=self.tk,
                w_resident_max_bytes=self.w_resident_max)

        if self._Np != N:                                   # only when N < 128
            out2d = out2d[:, :N]
        return out2d.reshape(*orig_shape[:-1], N)


# ----------------------------------------------------------------------------
# Reference (pure JAX) for verification.
# ----------------------------------------------------------------------------
def _reference_forward(layer: FullyConnectedLayer, x):
    w = layer.weight * layer.weight_gain
    b = layer.bias
    if b is not None and layer.bias_gain != 1.0:
        b = b * layer.bias_gain
    x32 = x.astype(jnp.float32)
    y = x32.reshape(-1, layer.in_features) @ w.T
    if b is not None:
        y = y + b
    spec = _ACT_SPECS[layer.activation]
    y = spec["fn"](y, spec["def_alpha"])
    if spec["def_gain"] != 1.0:
        y = y * spec["def_gain"]
    return y.reshape(*x.shape[:-1], layer.out_features)


if __name__ == "__main__":
    key = jax.random.PRNGKey(0)
    kx1, kx2, kx3, kw1, kw2, kw3, kw4, kw5 = jax.random.split(key, 8)

    # 1) Main fused path: whole-W resident in VMEM, M split into 2 parallel blocks
    #    (keeps both v7x TensorCores busy), lrelu + lr_multiplier, 3-D activation.
    x1 = jax.random.normal(kx1, (4, 64, 256), dtype=jnp.float32)
    fc1 = FullyConnectedLayer(256, 512, bias=True, activation="lrelu",
                              lr_multiplier=0.01, bias_init=0.1, key=kw1)
    o1 = jax.block_until_ready(fc1(x1))
    np.testing.assert_allclose(np.asarray(o1), np.asarray(_reference_forward(fc1, x1)),
                               rtol=2e-2, atol=2e-2)

    # 2) N-tiled path (forced small tiles, W not resident), no bias, relu.
    x2 = jax.random.normal(kx2, (2, 64, 256), dtype=jnp.float32)
    fc2 = FullyConnectedLayer(256, 384, bias=False, activation="relu", key=kw2,
                              tiles=(64, 128, 128), w_resident_max_bytes=0)
    o2 = jax.block_until_ready(fc2(x2))
    np.testing.assert_allclose(np.asarray(o2), np.asarray(_reference_forward(fc2, x2)),
                               rtol=2e-2, atol=2e-2)

    # 3) K-tiled reduction path (forced): f32 output accumulates directly in o_ref;
    #    the bf16-input call exercises the separate f32 VMEM accumulator variant.
    x3 = jax.random.normal(kx3, (64, 512), dtype=jnp.float32)
    fc3 = FullyConnectedLayer(512, 256, bias=True, activation="linear",
                              bias_init=0.5, key=kw3,
                              tiles=(128, 128, 128), k_single_max=128)
    o3 = jax.block_until_ready(fc3(x3))
    np.testing.assert_allclose(np.asarray(o3), np.asarray(_reference_forward(fc3, x3)),
                               rtol=2e-2, atol=2e-2)
    o3b = jax.block_until_ready(fc3(x3.astype(jnp.bfloat16)))
    np.testing.assert_allclose(np.asarray(o3b, dtype=np.float32),
                               np.asarray(_reference_forward(fc3, x3)),
                               rtol=6e-2, atol=6e-2)

    # 4) bf16 compute path (cast happens inside the kernel) + narrow-N padding (N < 128).
    x4 = jax.random.normal(kx1, (128, 256), dtype=jnp.float32)
    fc4 = FullyConnectedLayer(256, 64, bias=True, activation="linear",
                              bias_init=0.25, key=kw4, compute_dtype=jnp.bfloat16)
    o4 = jax.block_until_ready(fc4(x4))
    np.testing.assert_allclose(np.asarray(o4), np.asarray(_reference_forward(fc4, x4)),
                               rtol=6e-2, atol=6e-2)

    # 5) Small-problem XLA fallback (below FLOP threshold), swish.
    x5 = jax.random.normal(kx2, (16, 32), dtype=jnp.float32)
    fc5 = FullyConnectedLayer(32, 64, bias=True, activation="swish",
                              bias_init=0.0, key=kw5)
    o5 = jax.block_until_ready(fc5(x5))
    np.testing.assert_allclose(np.asarray(o5), np.asarray(_reference_forward(fc5, x5)),
                               rtol=2e-2, atol=2e-2)

    print("KERNEL_OK")
</pallas_src>

<mosaic_0001>
module attributes {stable_mosaic.version = 11 : i64} {
  func.func @kernel(%arg0: i32, %arg1: i32, %arg2: memref<128x256xf32, #tpu.memory_space<vmem>>, %arg3: memref<256x512xf32, #tpu.memory_space<vmem>>, %arg4: memref<1x512xf32, #tpu.memory_space<vmem>>, %arg5: memref<128x512xf32, #tpu.memory_space<vmem>>) attributes {dimension_semantics = [#tpu.dimension_semantics<parallel>, #tpu.dimension_semantics<parallel>], iteration_bounds = array<i64: 2, 1>, scalar_prefetch = 0 : i64, scratch_operands = 0 : i64, tpu.core_type = #tpu.core_type<tc>, window_params = [{transform_indices = @transform_0, window_bounds = array<i64: 128, 256>}, {transform_indices = @transform_1, window_bounds = array<i64: 256, 512>}, {transform_indices = @transform_2, window_bounds = array<i64: 1, 512>}, {transform_indices = @transform_3, window_bounds = array<i64: 128, 512>}]} {
    %c0 = arith.constant 0 : index
    %c0_0 = arith.constant 0 : index
    %0 = vector.load %arg2[%c0, %c0_0] : memref<128x256xf32, #tpu.memory_space<vmem>>, vector<128x256xf32>
    %c0_1 = arith.constant 0 : index
    %c0_2 = arith.constant 0 : index
    %1 = vector.load %arg3[%c0_1, %c0_2] : memref<256x512xf32, #tpu.memory_space<vmem>>, vector<256x512xf32>
    %cst = arith.constant dense<0.000000e+00> : vector<128x512xf32>
    %2 = tpu.matmul %0, %1, %cst {dimension_numbers = #tpu.dot_dimension_numbers<[1], [0], [0], [1], [0, 0, 1, 1], [], []>} : vector<128x256xf32>, vector<256x512xf32>, vector<128x512xf32> -> vector<128x512xf32>
    %c0_3 = arith.constant 0 : index
    %c0_4 = arith.constant 0 : index
    %3 = vector.load %arg4[%c0_3, %c0_4] : memref<1x512xf32, #tpu.memory_space<vmem>>, vector<1x512xf32>
    %4 = vector.broadcast %3 : vector<1x512xf32> to vector<128x512xf32>
    %5 = arith.addf %2, %4 : vector<128x512xf32>
    %cst_5 = arith.constant 0.000000e+00 : f32
    %6 = vector.broadcast %cst_5 : f32 to vector<128x512xf32>
    %7 = arith.cmpf oge, %5, %6 : vector<128x512xf32>
    %cst_6 = arith.constant 2.000000e-01 : f32
    %8 = vector.broadcast %cst_6 : f32 to vector<128x512xf32>
    %9 = arith.mulf %5, %8 : vector<128x512xf32>
    %10 = arith.select %7, %5, %9 : vector<128x512xi1>, vector<128x512xf32>
    %cst_7 = arith.constant 1.41421354 : f32
    %11 = vector.broadcast %cst_7 : f32 to vector<128x512xf32>
    %12 = arith.mulf %10, %11 : vector<128x512xf32>
    %c0_8 = arith.constant 0 : index
    %c0_9 = arith.constant 0 : index
    %13 = vector.load %arg5[%c0_8, %c0_9] : memref<128x512xf32, #tpu.memory_space<vmem>>, vector<128x512xf32>
    tpu.vector_store %arg5[%c0_8, %c0_9], %12 {strides = array<i32>} : memref<128x512xf32, #tpu.memory_space<vmem>>, vector<128x512xf32>,
    return
  }
  func.func @transform_0(%arg0: i32, %arg1: i32) -> (i32, i32) {
    %c0_i32 = arith.constant 0 : i32
    %c0_i32_0 = arith.constant 0 : i32
    return %arg0, %c0_i32 : i32, i32
  }
  func.func @transform_1(%arg0: i32, %arg1: i32) -> (i32, i32) {
    %c0_i32 = arith.constant 0 : i32
    %c0_i32_0 = arith.constant 0 : i32
    return %c0_i32, %arg1 : i32, i32
  }
  func.func @transform_2(%arg0: i32, %arg1: i32) -> (i32, i32) {
    %c0_i32 = arith.constant 0 : i32
    %c0_i32_0 = arith.constant 0 : i32
    return %c0_i32, %arg1 : i32, i32
  }
  func.func @transform_3(%arg0: i32, %arg1: i32) -> (i32, i32) {
    %c0_i32 = arith.constant 0 : i32
    return %arg0, %arg1 : i32, i32
  }
}

</mosaic_0001>

<bundles_post_ra>
// kernel: tpu_custom_call.1
= control target key start
LH: loop header
LB: loop body
LE: loop exit
PB: predicated region body
PF: predicated region fallthrough
CT: control target
= control target key end

     0   :  { %8 = vsyncpa [#allocation3], 0  ;;  %s1934_s0 = inlined_call_operand.hbm [shape: f32[256,256], index: 0, kind: input, shape index: {}]   ;;  %s1935_s1 = inlined_call_operand.hbm [shape: f32[256,512], index: 1, kind: input, shape index: {}]   ;;  %s1936_s2 = inlined_call_operand.hbm [shape: f32[1,512], index: 2, kind: input, shape index: {}]   ;;  %s1937_s3 = inlined_call_operand.hbm [shape: f32[256,512], index: 3, kind: output, shape index: {}]  }
   0x1   :  { %10 = vsyncpa [#allocation3 + $0x1], 0 }
   0x2   :  { %11 = vsyncpa [#allocation6], 0 }
   0x3   :  { %12 = vsyncpa [#allocation4], 0 }
   0x4   :  { %14 = vsyncpa [#allocation4 + $0x1], 0  ;;  %s1510_s12 = smov 0   ;;  %s1512_s13 = smov 0  }
   0x5   :  { %s1514_s14 = smov 0   ;;  %s1516_s15 = smov 0  }
   0x6   :  { %s1518_s16 = smov 0   ;;  %s1520_s17 = smov 0  }
   0x7 LB: > { %s1200_s18 = sadd.s32 4294967295, %s1478_s17   ;;  %s1201_s19 = sadd.s32 4294967294, %s1478_s17   ;;  %s1478_s17 = sphi %s1520_s17, %s20_s17   ;;  %s1474_s16 = sphi %s1518_s16, %s1957_s16   ;;  %s1470_s15 = sphi %s1516_s15, %s1956_s15   ;;  %s1466_s14 = sphi %s1514_s14, %s1955_s14   ;;  %s1462_s13 = sphi %s1512_s13, %s1954_s13   ;;  %s1458_s12 = sphi %s1510_s12, %s1953_s12  }
   0x8   : > { %p52_p0 = scmp.ne.s32.totalorder %s1462_s13, %s1458_s12  ;;  %p1544_p1 = scmp.eq.s32.totalorder %s1200_s18, 0 }
   0x9   : > { %p1548_p2 = scmp.eq.s32.totalorder %s1200_s18, 1  ;;  %p136_p3 = scmp.eq.s32.totalorder %s1201_s19, 1 }
   0xa   : > { %s1941_s20 = scalar_select %p1544_p1, 1, 0 }
   0xb   : > { %p1554_p4 = por %p1544_p1, %p52_p0  ;;  %p1202_p5 = scmp.ge.s32.totalorder %s1478_s17, 1 }
   0xc   : > { %p1559_p6 = por %p136_p3, %p52_p0  ;;  %p143_p7 = scmp.lt.s32.totalorder %s1478_s17, 3 }
   0xd   : > { %s1943_s22 = scalar_select %p1554_p4, 1, 0 }
   0xe   : > { %s1944_s23 = scalar_select %p1559_p6, 1, 0 }
   0xf   : > { %p1564_p8 = pnand %p1202_p5, %p143_p7  ;;  %s1480_s25 = smov [#allocation5]  }
  0x10   : > { %s158_s26 = sshll.u32 %s1480_s25, 4  ;;  %s1481_s28 = smov [#allocation7]   ;;  %s159_s26 = int_to_ptr.vmem [resolvable:$true] %s158_s26 }
  0x11   : > { %p1237_p9 = pneg %p1564_p8  ;;  %s175_s29 = sshll.u32 %s1481_s28, 4  ;;  %s176_s29 = int_to_ptr.vmem [resolvable:$true] %s175_s29 }
  0x12   : > { %s1325_s30 = scalar_lea.vmem %s159_s26, 16384  ;;  %p1333_p5 = scmp.lt.s32.totalorder %s159_s26, %s159_s26 }
  0x13   : > { %p1573_p11 = pnand %p1237_p9, %p1544_p1  ;;  %p1326_p13 = scmp.ne.s32.totalorder %s159_s26, %s1325_s30 }
  0x14   : > { %p1334_p7 = scmp.lt.s32.totalorder %s1325_s30, %s1325_s30 }
  0x15   : > { %p1316_p12 = pneg %p1573_p11 }
  0x16   : > { %p1335_p10 = por %p1334_p7, %p1333_p5 }
  0x17   : > { %p1328_p0 = pnand %p1326_p13, %p1316_p12 }
  0x19   : > { %p1329_p3 = pneg %p1328_p0 }
  0x1b   : > { %p1336_p9 = pnand %p1335_p10, %p1329_p3 }
  0x1d   : > { %1339 = shalt.err (!%p1336_p9)
}
  0x1e   : > { %s1482_s4 = smov 512   ;;  %s1483_s5 = smov 32  }
  0x1f   : > { %1240 = dma.hbm_to_vmem [thread:$0]  (!%p1573_p11), %s1935_s1, 16384, %s159_s26, [#allocation6], %s1482_s4, %s1482_s4, %s1483_s5  }
  0x20   : > { %s1351_s8 = scalar_lea.vmem %s176_s29, 64  ;;  %p1359_p1 = scmp.lt.s32.totalorder %s176_s29, %s176_s29 }
  0x21   : > { %p1352_p6 = scmp.ne.s32.totalorder %s176_s29, %s1351_s8  ;;  %p1360_p4 = scmp.lt.s32.totalorder %s1351_s8, %s1351_s8 }
  0x23   : > { %p1354_p13 = pnand %p1352_p6, %p1316_p12  ;;  %p1361_p5 = por %p1360_p4, %p1359_p1 }
  0x25   : > { %p1355_p0 = pneg %p1354_p13 }
  0x27   : > { %p1362_p10 = pnand %p1361_p5, %p1355_p0 }
  0x29   : > { %1365 = shalt.err (!%p1362_p10)
}
  0x2a   : > { %1243 = dma.hbm_to_vmem [thread:$0]  (!%p1573_p11), %s1936_s2, 64, %s176_s29, [#allocation6]  }
  0x2b   : > { %s32_s11 = sadd.s32 1, %s1474_s16  ;;  %s39_s18 = sadd.s32 1, %s1466_s14 }
  0x2c   : > { %p34_p1 = scmp.ge.s32.totalorder %s32_s11, 2  ;;  %p46_p4 = scmp.ne.s32.totalorder %s1466_s14, %s1462_s13 }
  0x2d   : > { %p47_p6 = scmp.eq.s32.totalorder %s1478_s17, 0  ;;  %p1254_p12 = scmp.lt.s32.totalorder %s1478_s17, 2 }
  0x2e   : > { %s1959_s11 = smov (%p34_p1, %s32_s11), 0  ;;  %p1605_p7 = por %p1548_p2, %p46_p4 }
  0x2f   : > { %p48_p3 = por %p47_p6, %p46_p4  ;;  %s36_s25 = ssub.s32 %s1474_s16, %s1959_s11 }
  0x30   : > { %s186_s26 = sand.u32 1, %s1466_s14   ;;  %p37_p9 = scmp.eq.s32.totalorder %s36_s25, 0 }
  0x31   : > { %s1206_s27 = sshll.u32 %s186_s26, 8  ;;  %s1222_s28 = sshll.u32 %s1474_s16, 12 }
  0x32   : > { %s1614_s29 = scalar_select %p37_p9, %s1466_s14, %s39_s18  }
  0x33   : > { %s197_s5 = scalar_lea.hbm %s1934_s0, %s1222_s28  ;;  %s190_s6 = scalar_lea.vmem [#allocation2], %s1206_s27 }
  0x34   : > { %s198_s7 = sshll.u32 %s190_s6, 4  ;;  %p1621_p11 = pnand %p1254_p12, %p48_p3  ;;  %s199_s7 = int_to_ptr.vmem [resolvable:$true] %s198_s7 }
  0x35   : > { %s187_s8 = scalar_lea.sflag [#allocation3], %s186_s26  ;;  %s1379_s9 = scalar_lea.vmem %s199_s7, 4096 }
  0x36   : > { %p1368_p2 = pneg %p1621_p11  ;;  %p1380_p13 = scmp.ne.s32.totalorder %s199_s7, %s1379_s9 }
  0x37   : > { %s1484_s10 = smov [#allocation2]  }
  0x38   : > { %p1382_p0 = pnand %p1380_p13, %p1368_p2  ;;  %s1384_s18 = sshll.u32 %s1484_s10, 4  ;;  %s1385_s18 = int_to_ptr.vmem [resolvable:$false] %s1384_s18 }
  0x39   : > { %s1386_s25 = scalar_lea.vmem %s1385_s18, 8192  ;;  %p1387_p10 = scmp.lt.s32.totalorder %s199_s7, %s1385_s18 }
  0x3a   : > { %p1383_p5 = pneg %p1382_p0  ;;  %p1388_p1 = scmp.lt.s32.totalorder %s1386_s25, %s1379_s9 }
  0x3c   : > { %p1389_p4 = por %p1388_p1, %p1387_p10 }
  0x3e   : > { %p1390_p6 = pnand %p1389_p4, %p1383_p5 }
  0x40   : > { %1393 = shalt.err (!%p1390_p6)
}
  0x41   : > { %s1485_s27 = smov 256   ;;  %s1486_s28 = smov 16  }
  0x42   : > { %1247 = dma.hbm_to_vmem [thread:$0]  (!%p1621_p11), %s197_s5, 4096, %s199_s7, %s187_s8, %s1485_s27, %s1485_s27, %s1486_s28  }
  0x43   : > { %210 = sbr.rel (%p1564_p8) target bundleno = 434 (0x1b2), region = 32  ;;  %s1632_s26 = sand.u32 (!%p1564_p8), 1, %s1462_s13  }
  0x44   : > { %s1211_s30 = sshll.u32 (!%p1564_p8), %s1632_s26, 8  ;;  %s213_s4 = scalar_lea.sflag (!%p1564_p8), [#allocation3], %s1632_s26 }
  0x45   : > { %s1636_s6 = scalar_lea.vmem (!%p1564_p8), [#allocation2], %s1211_s30  ;;  %p1949_p12 = scmp.ne.s32.totalorder (!%p1564_p8), %s1943_s22, 0 }
  0x48   : > { %1445 = dma.done.wait (%p1949_p12), %s213_s4, 4096  }
  0x49   : > { %1447 = vsyncadd (%p1949_p12), %s213_s4, 4294963200  ;;  %p1950_p3 = scmp.ne.s32.totalorder %s1941_s20, 0 }
  0x4b   : > { %1449 = dma.done.wait (%p1950_p3), [#allocation6], 16448  }
  0x4c   : > { %1451 = vsyncadd (%p1950_p3), [#allocation6], 4294950848  ;;  %v345_v0 = vld [vmem:[#allocation5 + $0x1e8] sm:$0xff]  ;;  %v347_v1 = vld [vmem:[#allocation5 + $0x1f8] sm:$0xff]  ;;  %s1214_s20 = sshll.u32 %s1632_s26, 9  ;;  %s1224_s24 = sshll.u32 %s1470_s15, 13 }
  0x4d   : > { %v344_v2 = vld [vmem:[#allocation5 + $0x1e0] sm:$0xff]  ;;  %434 = vmatprep.subr.mxu0 %v345_v0  ;;  %595 = vmatprep.subr.mxu1 %v347_v1  ;;  %v346_v3 = vld [vmem:[#allocation5 + $0x1f0] sm:$0xff]  ;;  %v341_v4 = vld [vmem:[#allocation5 + $0x1c8] sm:$0xff]  ;;  %s1693_s22 = scalar_lea.vmem [#allocation8], %s1214_s20  ;;  %s1882_s15 = scalar_lea.hbm %s1937_s3, %s1224_s24 }
  0x4e   : > { %v343_v5 = vld [vmem:[#allocation5 + $0x1d8] sm:$0xff]  ;;  %435 = vmatpush1.msra.mxu0 %v344_v2  ;;  %596 = vmatpush1.msra.mxu1 %v346_v3  ;;  %v340_v6 = vld [vmem:[#allocation5 + $0x1c0] sm:$0xff]  ;;  %v342_v7 = vld [vmem:[#allocation5 + $0x1d0] sm:$0xff]  ;;  %s1093_s5 = sshll.u32 %s1693_s22, 4  ;;  %s1077_s8 = scalar_lea.sflag [#allocation4], %s1632_s26  ;;  %s1884_s5 = int_to_ptr.vmem [resolvable:$true] %s1093_s5 }
  0x4f   : > { %v337_v8 = vld [vmem:[#allocation5 + $0x1a8] sm:$0xff]  ;;  %436 = vmatprep.subr.mxu0 %v341_v4  ;;  %597 = vmatprep.subr.mxu1 %v343_v5  ;;  %v339_v9 = vld [vmem:[#allocation5 + $0x1b8] sm:$0xff]  ;;  %v336_v10 = vld [vmem:[#allocation5 + $0x1a0] sm:$0xff]  ;;  %s1394_s9 = scalar_lea.vmem %s1884_s5, 8192  ;;  %s1487_s10 = smov [#allocation8]  }
  0x50   : > { %v338_v11 = vld [vmem:[#allocation5 + $0x1b0] sm:$0xff]  ;;  %437 = vmatpush1.msra.mxu0 %v340_v6  ;;  %598 = vmatpush1.msra.mxu1 %v342_v7  ;;  %v333_v12 = vld [vmem:[#allocation5 + $0x188] sm:$0xff]  ;;  %v335_v13 = vld [vmem:[#allocation5 + $0x198] sm:$0xff]  ;;  %p1395_p8 = scmp.ne.s32.totalorder %s1884_s5, %s1394_s9  ;;  %s1398_s18 = sshll.u32 %s1487_s10, 4  ;;  %s1399_s18 = int_to_ptr.vmem [resolvable:$false] %s1398_s18 }
  0x51   : > { %438 = vmatprep.subr.mxu0 %v337_v8  ;;  %599 = vmatprep.subr.mxu1 %v339_v9  ;;  %v332_v14 = vld [vmem:[#allocation5 + $0x180] sm:$0xff]  ;;  %v334_v15 = vld [vmem:[#allocation5 + $0x190] sm:$0xff]  ;;  %v329_v16 = vld [vmem:[#allocation5 + $0x168] sm:$0xff]  ;;  %s1400_s25 = scalar_lea.vmem %s1399_s18, 16384  ;;  %p1401_p2 = scmp.lt.s32.totalorder %s1884_s5, %s1399_s18 }
  0x52   : > { %439 = vmatpush1.msra.mxu0 %v336_v10  ;;  %600 = vmatpush1.msra.mxu1 %v338_v11  ;;  %v331_v17 = vld [vmem:[#allocation5 + $0x178] sm:$0xff]  ;;  %v328_v18 = vld [vmem:[#allocation5 + $0x160] sm:$0xff]  ;;  %v330_v19 = vld [vmem:[#allocation5 + $0x170] sm:$0xff]  ;;  %p1396_p9 = pnand %p1395_p8, %p1605_p7  ;;  %p1402_p13 = scmp.lt.s32.totalorder %s1400_s25, %s1394_s9 }
  0x53   : > { %440 = vmatprep.subr.mxu0 %v333_v12  ;;  %601 = vmatprep.subr.mxu1 %v335_v13  ;;  %v325_v20 = vld [vmem:[#allocation5 + $0x148] sm:$0xff]  ;;  %v327_v21 = vld [vmem:[#allocation5 + $0x158] sm:$0xff]  ;;  %v324_v22 = vld [vmem:[#allocation5 + $0x140] sm:$0xff] }
  0x54   : > { %441 = vmatpush1.msra.mxu0 %v332_v14  ;;  %602 = vmatpush1.msra.mxu1 %v334_v15  ;;  %v326_v23 = vld [vmem:[#allocation5 + $0x150] sm:$0xff]  ;;  %v321_v24 = vld [vmem:[#allocation5 + $0x128] sm:$0xff]  ;;  %v323_v25 = vld [vmem:[#allocation5 + $0x138] sm:$0xff]  ;;  %p1397_p11 = pneg %p1396_p9  ;;  %p1403_p0 = por %p1402_p13, %p1401_p2 }
  0x55   : > { %442 = vmatprep.subr.mxu0 %v329_v16  ;;  %603 = vmatprep.subr.mxu1 %v331_v17  ;;  %v320_v26 = vld [vmem:[#allocation5 + $0x120] sm:$0xff]  ;;  %v322_v27 = vld [vmem:[#allocation5 + $0x130] sm:$0xff]  ;;  %v317_v28 = vld [vmem:[#allocation5 + $0x108] sm:$0xff] }
  0x56   : > { %443 = vmatpush1.msra.mxu0 %v328_v18  ;;  %604 = vmatpush1.msra.mxu1 %v330_v19  ;;  %v319_v29 = vld [vmem:[#allocation5 + $0x118] sm:$0xff]  ;;  %v316_v30 = vld [vmem:[#allocation5 + $0x100] sm:$0xff]  ;;  %v318_v31 = vld [vmem:[#allocation5 + $0x110] sm:$0xff]  ;;  %p1404_p5 = pnand %p1403_p0, %p1397_p11 }
  0x57   : > { %444 = vmatprep.subr.mxu0 %v325_v20  ;;  %605 = vmatprep.subr.mxu1 %v327_v21  ;;  %v313_v32 = vld [vmem:[#allocation5 + $0xe8] sm:$0xff]  ;;  %v315_v33 = vld [vmem:[#allocation5 + $0xf8] sm:$0xff]  ;;  %v312_v34 = vld [vmem:[#allocation5 + $0xe0] sm:$0xff] }
  0x58   : > { %445 = vmatpush1.msra.mxu0 %v324_v22  ;;  %606 = vmatpush1.msra.mxu1 %v326_v23  ;;  %v314_v35 = vld [vmem:[#allocation5 + $0xf0] sm:$0xff]  ;;  %v309_v36 = vld [vmem:[#allocation5 + $0xc8] sm:$0xff]  ;;  %v311_v37 = vld [vmem:[#allocation5 + $0xd8] sm:$0xff] }
  0x59   : > { %446 = vmatprep.subr.mxu0 %v321_v24  ;;  %607 = vmatprep.subr.mxu1 %v323_v25  ;;  %v308_v38 = vld [vmem:[#allocation5 + $0xc0] sm:$0xff]  ;;  %v310_v39 = vld [vmem:[#allocation5 + $0xd0] sm:$0xff]  ;;  %v305_v40 = vld [vmem:[#allocation5 + $0xa8] sm:$0xff] }
  0x5a   : > { %447 = vmatpush1.msra.mxu0 %v320_v26  ;;  %608 = vmatpush1.msra.mxu1 %v322_v27  ;;  %v307_v41 = vld [vmem:[#allocation5 + $0xb8] sm:$0xff]  ;;  %v304_v42 = vld [vmem:[#allocation5 + $0xa0] sm:$0xff]  ;;  %v306_v43 = vld [vmem:[#allocation5 + $0xb0] sm:$0xff] }
  0x5b   : > { %448 = vmatprep.subr.mxu0 %v317_v28  ;;  %609 = vmatprep.subr.mxu1 %v319_v29  ;;  %v301_v44 = vld [vmem:[#allocation5 + $0x88] sm:$0xff]  ;;  %v303_v45 = vld [vmem:[#allocation5 + $0x98] sm:$0xff]  ;;  %v300_v46 = vld [vmem:[#allocation5 + $0x80] sm:$0xff] }
  0x5c   : > { %449 = vmatpush1.msra.mxu0 %v316_v30  ;;  %610 = vmatpush1.msra.mxu1 %v318_v31  ;;  %v302_v47 = vld [vmem:[#allocation5 + $0x90] sm:$0xff]  ;;  %v297_v48 = vld [vmem:[#allocation5 + $0x68] sm:$0xff]  ;;  %v299_v49 = vld [vmem:[#allocation5 + $0x78] sm:$0xff] }
  0x5d   : > { %450 = vmatprep.subr.mxu0 %v313_v32  ;;  %611 = vmatprep.subr.mxu1 %v315_v33  ;;  %v296_v50 = vld [vmem:[#allocation5 + $0x60] sm:$0xff]  ;;  %v298_v51 = vld [vmem:[#allocation5 + $0x70] sm:$0xff]  ;;  %v293_v52 = vld [vmem:[#allocation5 + $0x48] sm:$0xff] }
  0x5e   : > { %451 = vmatpush1.msra.mxu0 %v312_v34  ;;  %612 = vmatpush1.msra.mxu1 %v314_v35  ;;  %v295_v53 = vld [vmem:[#allocation5 + $0x58] sm:$0xff]  ;;  %v292_v54 = vld [vmem:[#allocation5 + $0x40] sm:$0xff]  ;;  %v294_v55 = vld [vmem:[#allocation5 + $0x50] sm:$0xff] }
  0x5f   : > { %452 = vmatprep.subr.mxu0 %v309_v36  ;;  %613 = vmatprep.subr.mxu1 %v311_v37  ;;  %v289_v56 = vld [vmem:[#allocation5 + $0x28] sm:$0xff]  ;;  %v291_v57 = vld [vmem:[#allocation5 + $0x38] sm:$0xff]  ;;  %v288_v58 = vld [vmem:[#allocation5 + $0x20] sm:$0xff] }
  0x60   : > { %453 = vmatpush1.msra.mxu0 %v308_v38  ;;  %614 = vmatpush1.msra.mxu1 %v310_v39  ;;  %v290_v59 = vld [vmem:[#allocation5 + $0x30] sm:$0xff]  ;;  %v285_v60 = vld [vmem:[#allocation5 + $0x8] sm:$0xff]  ;;  %v287_v61 = vld [vmem:[#allocation5 + $0x18] sm:$0xff] }
  0x61   : > { %454 = vmatprep.subr.mxu0 %v305_v40  ;;  %615 = vmatprep.subr.mxu1 %v307_v41  ;;  %v284_v62 = vld [vmem:[#allocation5] sm:$0xff]  ;;  %v286_v63 = vld [vmem:[#allocation5 + $0x10] sm:$0xff]  ;;  %v409_v0 = vld [vmem:[#allocation5 + $0x3e8] sm:$0xff] }
  0x62   : > { %455 = vmatpush1.msra.mxu0 %v304_v42  ;;  %616 = vmatpush1.msra.mxu1 %v306_v43  ;;  %v411_v1 = vld [vmem:[#allocation5 + $0x3f8] sm:$0xff]  ;;  %v408_v2 = vld [vmem:[#allocation5 + $0x3e0] sm:$0xff]  ;;  %v410_v3 = vld [vmem:[#allocation5 + $0x3f0] sm:$0xff] }
  0x63   : > { %456 = vmatprep.subr.mxu0 %v301_v44  ;;  %617 = vmatprep.subr.mxu1 %v303_v45  ;;  %v405_v4 = vld [vmem:[#allocation5 + $0x3c8] sm:$0xff]  ;;  %v407_v5 = vld [vmem:[#allocation5 + $0x3d8] sm:$0xff]  ;;  %v404_v6 = vld [vmem:[#allocation5 + $0x3c0] sm:$0xff] }
  0x64   : > { %457 = vmatpush1.msra.mxu0 %v300_v46  ;;  %618 = vmatpush1.msra.mxu1 %v302_v47  ;;  %v406_v7 = vld [vmem:[#allocation5 + $0x3d0] sm:$0xff]  ;;  %v401_v8 = vld [vmem:[#allocation5 + $0x3a8] sm:$0xff]  ;;  %v403_v9 = vld [vmem:[#allocation5 + $0x3b8] sm:$0xff] }
  0x65   : > { %458 = vmatprep.subr.mxu0 %v297_v48  ;;  %619 = vmatprep.subr.mxu1 %v299_v49  ;;  %v400_v10 = vld [vmem:[#allocation5 + $0x3a0] sm:$0xff]  ;;  %v402_v11 = vld [vmem:[#allocation5 + $0x3b0] sm:$0xff]  ;;  %v397_v12 = vld [vmem:[#allocation5 + $0x388] sm:$0xff] }
  0x66   : > { %459 = vmatpush1.msra.mxu0 %v296_v50  ;;  %620 = vmatpush1.msra.mxu1 %v298_v51  ;;  %v399_v13 = vld [vmem:[#allocation5 + $0x398] sm:$0xff]  ;;  %v396_v14 = vld [vmem:[#allocation5 + $0x380] sm:$0xff]  ;;  %v398_v15 = vld [vmem:[#allocation5 + $0x390] sm:$0xff] }
  0x67   : > { %460 = vmatprep.subr.mxu0 %v293_v52  ;;  %621 = vmatprep.subr.mxu1 %v295_v53  ;;  %v393_v16 = vld [vmem:[#allocation5 + $0x368] sm:$0xff]  ;;  %v395_v17 = vld [vmem:[#allocation5 + $0x378] sm:$0xff]  ;;  %v392_v18 = vld [vmem:[#allocation5 + $0x360] sm:$0xff] }
  0x68   : > { %461 = vmatpush1.msra.mxu0 %v292_v54  ;;  %622 = vmatpush1.msra.mxu1 %v294_v55  ;;  %v394_v19 = vld [vmem:[#allocation5 + $0x370] sm:$0xff]  ;;  %v389_v20 = vld [vmem:[#allocation5 + $0x348] sm:$0xff]  ;;  %v391_v21 = vld [vmem:[#allocation5 + $0x358] sm:$0xff] }
  0x69   : > { %462 = vmatprep.subr.mxu0 %v289_v56  ;;  %623 = vmatprep.subr.mxu1 %v291_v57  ;;  %v388_v22 = vld [vmem:[#allocation5 + $0x340] sm:$0xff]  ;;  %v390_v23 = vld [vmem:[#allocation5 + $0x350] sm:$0xff]  ;;  %v385_v24 = vld [vmem:[#allocation5 + $0x328] sm:$0xff] }
  0x6a   : > { %463 = vmatpush1.msra.mxu0 %v288_v58  ;;  %624 = vmatpush1.msra.mxu1 %v290_v59  ;;  %v387_v25 = vld [vmem:[#allocation5 + $0x338] sm:$0xff]  ;;  %v384_v26 = vld [vmem:[#allocation5 + $0x320] sm:$0xff]  ;;  %v386_v27 = vld [vmem:[#allocation5 + $0x330] sm:$0xff] }
  0x6b   : > { %464 = vmatprep.subr.mxu0 %v285_v60  ;;  %625 = vmatprep.subr.mxu1 %v287_v61  ;;  %v381_v28 = vld [vmem:[#allocation5 + $0x308] sm:$0xff]  ;;  %v383_v29 = vld [vmem:[#allocation5 + $0x318] sm:$0xff]  ;;  %v380_v30 = vld [vmem:[#allocation5 + $0x300] sm:$0xff] }
  0x6c   : > { %465 = vmatpush1.msra.mxu0 %v284_v62  ;;  %626 = vmatpush1.msra.mxu1 %v286_v63  ;;  %v382_v31 = vld [vmem:[#allocation5 + $0x310] sm:$0xff]  ;;  %v377_v32 = vld [vmem:[#allocation5 + $0x2e8] sm:$0xff]  ;;  %v379_v33 = vld [vmem:[#allocation5 + $0x2f8] sm:$0xff] }
  0x6d   : > { %466 = vmatprep.subr.mxu0 %v409_v0  ;;  %627 = vmatprep.subr.mxu1 %v411_v1  ;;  %v376_v34 = vld [vmem:[#allocation5 + $0x2e0] sm:$0xff]  ;;  %v378_v35 = vld [vmem:[#allocation5 + $0x2f0] sm:$0xff]  ;;  %v373_v36 = vld [vmem:[#allocation5 + $0x2c8] sm:$0xff] }
  0x6e   : > { %467 = vmatpush2.msra.mxu0 %v408_v2  ;;  %628 = vmatpush2.msra.mxu1 %v410_v3  ;;  %v375_v37 = vld [vmem:[#allocation5 + $0x2d8] sm:$0xff]  ;;  %v372_v38 = vld [vmem:[#allocation5 + $0x2c0] sm:$0xff]  ;;  %v374_v39 = vld [vmem:[#allocation5 + $0x2d0] sm:$0xff] }
  0x6f   : > { %468 = vmatprep.subr.mxu0 %v405_v4  ;;  %629 = vmatprep.subr.mxu1 %v407_v5  ;;  %v369_v40 = vld [vmem:[#allocation5 + $0x2a8] sm:$0xff]  ;;  %v371_v41 = vld [vmem:[#allocation5 + $0x2b8] sm:$0xff]  ;;  %v368_v42 = vld [vmem:[#allocation5 + $0x2a0] sm:$0xff] }
  0x70   : > { %469 = vmatpush2.msra.mxu0 %v404_v6  ;;  %630 = vmatpush2.msra.mxu1 %v406_v7  ;;  %v370_v43 = vld [vmem:[#allocation5 + $0x2b0] sm:$0xff]  ;;  %v365_v44 = vld [vmem:[#allocation5 + $0x288] sm:$0xff]  ;;  %v367_v45 = vld [vmem:[#allocation5 + $0x298] sm:$0xff] }
  0x71   : > { %470 = vmatprep.subr.mxu0 %v401_v8  ;;  %631 = vmatprep.subr.mxu1 %v403_v9  ;;  %v364_v46 = vld [vmem:[#allocation5 + $0x280] sm:$0xff]  ;;  %v366_v47 = vld [vmem:[#allocation5 + $0x290] sm:$0xff]  ;;  %v361_v48 = vld [vmem:[#allocation5 + $0x268] sm:$0xff] }
  0x72   : > { %471 = vmatpush2.msra.mxu0 %v400_v10  ;;  %632 = vmatpush2.msra.mxu1 %v402_v11  ;;  %v363_v49 = vld [vmem:[#allocation5 + $0x278] sm:$0xff]  ;;  %v360_v50 = vld [vmem:[#allocation5 + $0x260] sm:$0xff]  ;;  %v362_v51 = vld [vmem:[#allocation5 + $0x270] sm:$0xff] }
  0x73   : > { %472 = vmatprep.subr.mxu0 %v397_v12  ;;  %633 = vmatprep.subr.mxu1 %v399_v13  ;;  %v357_v52 = vld [vmem:[#allocation5 + $0x248] sm:$0xff]  ;;  %v359_v53 = vld [vmem:[#allocation5 + $0x258] sm:$0xff]  ;;  %v356_v54 = vld [vmem:[#allocation5 + $0x240] sm:$0xff] }
  0x74   : > { %473 = vmatpush2.msra.mxu0 %v396_v14  ;;  %634 = vmatpush2.msra.mxu1 %v398_v15  ;;  %v358_v55 = vld [vmem:[#allocation5 + $0x250] sm:$0xff]  ;;  %v353_v56 = vld [vmem:[#allocation5 + $0x228] sm:$0xff]  ;;  %v355_v57 = vld [vmem:[#allocation5 + $0x238] sm:$0xff] }
  0x75   : > { %474 = vmatprep.subr.mxu0 %v393_v16  ;;  %635 = vmatprep.subr.mxu1 %v395_v17  ;;  %v352_v58 = vld [vmem:[#allocation5 + $0x220] sm:$0xff]  ;;  %v354_v59 = vld [vmem:[#allocation5 + $0x230] sm:$0xff]  ;;  %v349_v60 = vld [vmem:[#allocation5 + $0x208] sm:$0xff] }
  0x76   : > { %475 = vmatpush2.msra.mxu0 %v392_v18  ;;  %636 = vmatpush2.msra.mxu1 %v394_v19  ;;  %v351_v61 = vld [vmem:[#allocation5 + $0x218] sm:$0xff]  ;;  %v348_v62 = vld [vmem:[#allocation5 + $0x200] sm:$0xff]  ;;  %v253_v63 = vld [vmem:[%s1636_s6 + $0x8] sm:$0xff] }
  0x77   : > { %476 = vmatprep.subr.mxu0 %v389_v20  ;;  %637 = vmatprep.subr.mxu1 %v391_v21  ;;  %v350_v0 = vld [vmem:[#allocation5 + $0x210] sm:$0xff]  ;;  %v252_v1 = vld [vmem:[%s1636_s6] sm:$0xff]  ;;  %v255_v2 = vld [vmem:[%s1636_s6 + $0x18] sm:$0xff] }
  0x78   : > { %477 = vmatpush2.msra.mxu0 %v388_v22  ;;  %638 = vmatpush2.msra.mxu1 %v390_v23  ;;  %v254_v3 = vld [vmem:[%s1636_s6 + $0x10] sm:$0xff]  ;;  %v257_v4 = vld [vmem:[%s1636_s6 + $0x28] sm:$0xff]  ;;  %v256_v5 = vld [vmem:[%s1636_s6 + $0x20] sm:$0xff] }
  0x79   : > { %478 = vmatprep.subr.mxu0 %v385_v24  ;;  %639 = vmatprep.subr.mxu1 %v387_v25  ;;  %v259_v6 = vld [vmem:[%s1636_s6 + $0x38] sm:$0xff]  ;;  %v258_v7 = vld [vmem:[%s1636_s6 + $0x30] sm:$0xff]  ;;  %v261_v8 = vld [vmem:[%s1636_s6 + $0x48] sm:$0xff] }
  0x7a   : > { %479 = vmatpush2.msra.mxu0 %v384_v26  ;;  %640 = vmatpush2.msra.mxu1 %v386_v27  ;;  %v260_v9 = vld [vmem:[%s1636_s6 + $0x40] sm:$0xff]  ;;  %v263_v10 = vld [vmem:[%s1636_s6 + $0x58] sm:$0xff]  ;;  %v262_v11 = vld [vmem:[%s1636_s6 + $0x50] sm:$0xff] }
  0x7b   : > { %480 = vmatprep.subr.mxu0 %v381_v28  ;;  %641 = vmatprep.subr.mxu1 %v383_v29  ;;  %v265_v12 = vld [vmem:[%s1636_s6 + $0x68] sm:$0xff]  ;;  %v264_v13 = vld [vmem:[%s1636_s6 + $0x60] sm:$0xff]  ;;  %v267_v14 = vld [vmem:[%s1636_s6 + $0x78] sm:$0xff] }
  0x7c   : > { %481 = vmatpush2.msra.mxu0 %v380_v30  ;;  %642 = vmatpush2.msra.mxu1 %v382_v31  ;;  %v266_v15 = vld [vmem:[%s1636_s6 + $0x70] sm:$0xff]  ;;  %v269_v16 = vld [vmem:[%s1636_s6 + $0x88] sm:$0xff]  ;;  %v268_v17 = vld [vmem:[%s1636_s6 + $0x80] sm:$0xff] }
  0x7d   : > { %482 = vmatprep.subr.mxu0 %v377_v32  ;;  %643 = vmatprep.subr.mxu1 %v379_v33  ;;  %v271_v18 = vld [vmem:[%s1636_s6 + $0x98] sm:$0xff]  ;;  %v270_v19 = vld [vmem:[%s1636_s6 + $0x90] sm:$0xff]  ;;  %v273_v20 = vld [vmem:[%s1636_s6 + $0xa8] sm:$0xff]  ;;  %v414_v32 = vlaneseq }
  0x7e   : > { %483 = vmatpush2.msra.mxu0 %v376_v34  ;;  %644 = vmatpush2.msra.mxu1 %v378_v35  ;;  %v272_v21 = vld [vmem:[%s1636_s6 + $0xa0] sm:$0xff]  ;;  %v275_v22 = vld [vmem:[%s1636_s6 + $0xb8] sm:$0xff]  ;;  %v274_v23 = vld [vmem:[%s1636_s6 + $0xb0] sm:$0xff] }
  0x7f   : > { %484 = vmatprep.subr.mxu0 %v373_v36  ;;  %645 = vmatprep.subr.mxu1 %v375_v37  ;;  %v277_v24 = vld [vmem:[%s1636_s6 + $0xc8] sm:$0xff]  ;;  %v276_v25 = vld [vmem:[%s1636_s6 + $0xc0] sm:$0xff]  ;;  %v279_v26 = vld [vmem:[%s1636_s6 + $0xd8] sm:$0xff]  ;;  %v415_v33 = vshrl.u32 %v414_v32, 7 }
  0x80   : > { %485 = vmatpush2.msra.mxu0 %v372_v38  ;;  %646 = vmatpush2.msra.mxu1 %v374_v39  ;;  %v278_v27 = vld [vmem:[%s1636_s6 + $0xd0] sm:$0xff]  ;;  %v281_v28 = vld [vmem:[%s1636_s6 + $0xe8] sm:$0xff]  ;;  %v280_v29 = vld [vmem:[%s1636_s6 + $0xe0] sm:$0xff] }
  0x81   : > { %486 = vmatprep.subr.mxu0 %v369_v40  ;;  %647 = vmatprep.subr.mxu1 %v371_v41  ;;  %v283_v30 = vld [vmem:[%s1636_s6 + $0xf8] sm:$0xff]  ;;  %v282_v31 = vld [vmem:[%s1636_s6 + $0xf0] sm:$0xff]  ;;  %v416_v34 = vsub.s32 0, %v415_v33  ;;  %v424_v35 = vsub.s32 2, %v415_v33  ;;  %v412_v36 = vld [vmem:[#allocation7] sm:$0xf] }
  0x82   : > { %487 = vmatpush2.msra.mxu0 %v368_v42  ;;  %648 = vmatpush2.msra.mxu1 %v370_v43  ;;  %v420_v37 = vsub.s32 1, %v415_v33  ;;  %v428_v38 = vsub.s32 3, %v415_v33 }
  0x83   : > { %488 = vmatprep.subr.mxu0 %v365_v44  ;;  %649 = vmatprep.subr.mxu1 %v367_v45  ;;  %v1678_v39 = vrot.slane %v412_v36, %v416_v34  ;;  %v1680_v40 = vrot.slane %v412_v36, %v424_v35 }
  0x84   : > { %489 = vmatpush2.msra.mxu0 %v364_v46  ;;  %650 = vmatpush2.msra.mxu1 %v366_v47  ;;  %v1682_v43 = vrot.slane %v412_v36, %v420_v37  ;;  %v1684_v44 = vrot.slane %v412_v36, %v428_v38 }
  0x85   : > { %490 = vmatprep.subr.mxu0 %v361_v48  ;;  %651 = vmatprep.subr.mxu1 %v363_v49 }
  0x86   : > { %491 = vmatpush2.msra.mxu0 %v360_v50  ;;  %652 = vmatpush2.msra.mxu1 %v362_v51 }
  0x87   : > { %492 = vmatprep.subr.mxu0 %v357_v52  ;;  %653 = vmatprep.subr.mxu1 %v359_v53 }
  0x88   : > { %493 = vmatpush2.msra.mxu0 %v356_v54  ;;  %654 = vmatpush2.msra.mxu1 %v358_v55 }
  0x89   : > { %494 = vmatprep.subr.mxu0 %v353_v56  ;;  %655 = vmatprep.subr.mxu1 %v355_v57 }
  0x8a   : > { %495 = vmatpush2.msra.mxu0 %v352_v58  ;;  %656 = vmatpush2.msra.mxu1 %v354_v59 }
  0x8b   : > { %496 = vmatprep.subr.mxu0 %v349_v60  ;;  %657 = vmatprep.subr.mxu1 %v351_v61 }
  0x8c   : > { %497 = vmatpush2.msra.mxu0 %v348_v62  ;;  %498 = vmatprep.mubr.f32.mxu0 %v253_v63 }
  0x8d   : > { %658 = vmatpush2.msra.mxu1 %v350_v0  ;;  %659 = vmatprep.mubr.f32.mxu1 %v253_v63 }
  0x8e   : > { %499 = vmatmul.mubr.f32.vlgmr.msra.gmra.mxu0 %v252_v1  ;;  %660 = vmatmul.mubr.f32.vlgmr.msra.gmra.mxu1 %v252_v1 }
  0x8f   : > { %504 = vmatprep.mubr.f32.mxu0 %v255_v2  ;;  %665 = vmatprep.mubr.f32.mxu1 %v255_v2 }
  0x92   : > { %505 = vmatmul.mubr.f32.gmra.mxu0 %v254_v3  ;;  %666 = vmatmul.mubr.f32.gmra.mxu1 %v254_v3 }
  0x93   : > { %510 = vmatprep.mubr.f32.mxu0 %v257_v4  ;;  %671 = vmatprep.mubr.f32.mxu1 %v257_v4 }
  0x96   : > { %511 = vmatmul.mubr.f32.gmra.mxu0 %v256_v5  ;;  %672 = vmatmul.mubr.f32.gmra.mxu1 %v256_v5 }
  0x97   : > { %516 = vmatprep.mubr.f32.mxu0 %v259_v6  ;;  %677 = vmatprep.mubr.f32.mxu1 %v259_v6 }
  0x9a   : > { %517 = vmatmul.mubr.f32.gmra.mxu0 %v258_v7  ;;  %678 = vmatmul.mubr.f32.gmra.mxu1 %v258_v7 }
  0x9b   : > { %522 = vmatprep.mubr.f32.mxu0 %v261_v8  ;;  %683 = vmatprep.mubr.f32.mxu1 %v261_v8 }
  0x9e   : > { %523 = vmatmul.mubr.f32.gmra.mxu0 %v260_v9  ;;  %684 = vmatmul.mubr.f32.gmra.mxu1 %v260_v9 }
  0x9f   : > { %528 = vmatprep.mubr.f32.mxu0 %v263_v10  ;;  %689 = vmatprep.mubr.f32.mxu1 %v263_v10 }
  0xa2   : > { %529 = vmatmul.mubr.f32.gmra.mxu0 %v262_v11  ;;  %690 = vmatmul.mubr.f32.gmra.mxu1 %v262_v11 }
  0xa3   : > { %534 = vmatprep.mubr.f32.mxu0 %v265_v12  ;;  %695 = vmatprep.mubr.f32.mxu1 %v265_v12 }
  0xa6   : > { %535 = vmatmul.mubr.f32.gmra.mxu0 %v264_v13  ;;  %696 = vmatmul.mubr.f32.gmra.mxu1 %v264_v13 }
  0xa7   : > { %540 = vmatprep.mubr.f32.mxu0 %v267_v14  ;;  %701 = vmatprep.mubr.f32.mxu1 %v267_v14 }
  0xaa   : > { %541 = vmatmul.mubr.f32.gmra.mxu0 %v266_v15  ;;  %702 = vmatmul.mubr.f32.gmra.mxu1 %v266_v15 }
  0xab   : > { %546 = vmatprep.mubr.f32.mxu0 %v269_v16  ;;  %707 = vmatprep.mubr.f32.mxu1 %v269_v16 }
  0xae   : > { %547 = vmatmul.mubr.f32.gmra.mxu0 %v268_v17  ;;  %708 = vmatmul.mubr.f32.gmra.mxu1 %v268_v17 }
  0xaf   : > { %552 = vmatprep.mubr.f32.mxu0 %v271_v18  ;;  %713 = vmatprep.mubr.f32.mxu1 %v271_v18 }
  0xb2   : > { %553 = vmatmul.mubr.f32.gmra.mxu0 %v270_v19  ;;  %714 = vmatmul.mubr.f32.gmra.mxu1 %v270_v19 }
  0xb3   : > { %558 = vmatprep.mubr.f32.mxu0 %v273_v20  ;;  %719 = vmatprep.mubr.f32.mxu1 %v273_v20 }
  0xb6   : > { %559 = vmatmul.mubr.f32.gmra.mxu0 %v272_v21  ;;  %720 = vmatmul.mubr.f32.gmra.mxu1 %v272_v21 }
  0xb7   : > { %564 = vmatprep.mubr.f32.mxu0 %v275_v22  ;;  %725 = vmatprep.mubr.f32.mxu1 %v275_v22 }
  0xba   : > { %565 = vmatmul.mubr.f32.gmra.mxu0 %v274_v23  ;;  %726 = vmatmul.mubr.f32.gmra.mxu1 %v274_v23 }
  0xbb   : > { %570 = vmatprep.mubr.f32.mxu0 %v277_v24  ;;  %731 = vmatprep.mubr.f32.mxu1 %v277_v24 }
  0xbe   : > { %571 = vmatmul.mubr.f32.gmra.mxu0 %v276_v25  ;;  %732 = vmatmul.mubr.f32.gmra.mxu1 %v276_v25 }
  0xbf   : > { %576 = vmatprep.mubr.f32.mxu0 %v279_v26  ;;  %737 = vmatprep.mubr.f32.mxu1 %v279_v26 }
  0xc2   : > { %577 = vmatmul.mubr.f32.gmra.mxu0 %v278_v27  ;;  %738 = vmatmul.mubr.f32.gmra.mxu1 %v278_v27 }
  0xc3   : > { %582 = vmatprep.mubr.f32.mxu0 %v281_v28  ;;  %743 = vmatprep.mubr.f32.mxu1 %v281_v28 }
  0xc6   : > { %583 = vmatmul.mubr.f32.gmra.mxu0 %v280_v29  ;;  %744 = vmatmul.mubr.f32.gmra.mxu1 %v280_v29 }
  0xc7   : > { %588 = vmatprep.mubr.f32.mxu0 %v283_v30  ;;  %749 = vmatprep.mubr.f32.mxu1 %v283_v30 }
  0xca   : > { %589 = vmatmul.mubr.f32.gmra.mxu0 %v282_v31  ;;  %750 = vmatmul.mubr.f32.gmra.mxu1 %v282_v31 }
 0x14e   : > { %v500_v41 = vpop.f32.mrf.mxu0  ;;  %v661_v42 = vpop.f32.mrf.mxu1 }
 0x14f   : > { %v501_v45 = vadd.f32 %v500_v41, %v1678_v39  ;;  %v662_v46 = vadd.f32 %v661_v42, %v1680_v40 }
 0x150   : > { %v502_v47 = vpop.f32.mrf.mxu0  ;;  %v663_v48 = vpop.f32.mrf.mxu1 }
 0x151   : > { %vm756_vm0 = vcmp.ge.f32.partialorder %v501_v45, 0.0  ;;  %v820_v49 = vmul.f32 0.2, %v501_v45  ;;  %vm758_vm1 = vcmp.ge.f32.partialorder %v662_v46, 0.0  ;;  %v822_v50 = vmul.f32 0.2, %v662_v46 }
 0x152   : > { %v503_v51 = vadd.f32 %v502_v47, %v1682_v43  ;;  %v664_v52 = vadd.f32 %v663_v48, %v1684_v44  ;;  %v506_v53 = vpop.f32.mrf.mxu0  ;;  %v667_v54 = vpop.f32.mrf.mxu1 }
 0x153   : > { %v884_v55 = vsel %vm756_vm0, %v501_v45, %v820_v49  ;;  %v886_v56 = vsel %vm758_vm1, %v662_v46, %v822_v50  ;;  %v507_v57 = vadd.f32 %v506_v53, %v1678_v39  ;;  %v668_v58 = vadd.f32 %v667_v54, %v1680_v40 }
 0x154   : > { %v948_v59 = vmul.f32 1.4142135, %v884_v55  ;;  %v950_v60 = vmul.f32 1.4142135, %v886_v56  ;;  %vm757_vm2 = vcmp.ge.f32.partialorder %v503_v51, 0.0  ;;  %vm759_vm3 = vcmp.ge.f32.partialorder %v664_v52, 0.0  ;;  %v508_v61 = vpop.f32.mrf.mxu0  ;;  %v669_v62 = vpop.f32.mrf.mxu1 }
 0x155   : > { %v821_v63 = vmul.f32 0.2, %v503_v51  ;;  %v823_v0 = vmul.f32 0.2, %v664_v52  ;;  %vm760_vm4 = vcmp.ge.f32.partialorder %v507_v57, 0.0  ;;  %vm762_vm5 = vcmp.ge.f32.partialorder %v668_v58, 0.0 }
 0x156   : > { %1012 = vst [vmem:[%s1693_s22] sm:$0xff] %v948_v59  ;;  %1014 = vst [vmem:[%s1693_s22 + $0x10] sm:$0xff] %v950_v60  ;;  %v824_v1 = vmul.f32 0.2, %v507_v57  ;;  %v826_v2 = vmul.f32 0.2, %v668_v58  ;;  %v509_v3 = vadd.f32 %v508_v61, %v1682_v43  ;;  %v670_v4 = vadd.f32 %v669_v62, %v1684_v44  ;;  %v512_v5 = vpop.f32.mrf.mxu0  ;;  %v673_v6 = vpop.f32.mrf.mxu1 }
 0x157   : > { %v885_v7 = vsel %vm757_vm2, %v503_v51, %v821_v63  ;;  %v887_v8 = vsel %vm759_vm3, %v664_v52, %v823_v0  ;;  %v513_v9 = vadd.f32 %v512_v5, %v1678_v39  ;;  %v674_v10 = vadd.f32 %v673_v6, %v1680_v40 }
 0x158   : > { %v949_v11 = vmul.f32 1.4142135, %v885_v7  ;;  %v951_v12 = vmul.f32 1.4142135, %v887_v8  ;;  %v888_v13 = vsel %vm760_vm4, %v507_v57, %v824_v1  ;;  %v890_v14 = vsel %vm762_vm5, %v668_v58, %v826_v2  ;;  %v514_v15 = vpop.f32.mrf.mxu0  ;;  %v675_v16 = vpop.f32.mrf.mxu1 }
 0x159   : > { %v952_v17 = vmul.f32 1.4142135, %v888_v13  ;;  %v954_v18 = vmul.f32 1.4142135, %v890_v14  ;;  %vm761_vm6 = vcmp.ge.f32.partialorder %v509_v3, 0.0  ;;  %vm763_vm7 = vcmp.ge.f32.partialorder %v670_v4, 0.0 }
 0x15a   : > { %1013 = vst [vmem:[%s1693_s22 + $0x8] sm:$0xff] %v949_v11  ;;  %1015 = vst [vmem:[%s1693_s22 + $0x18] sm:$0xff] %v951_v12  ;;  %v825_v19 = vmul.f32 0.2, %v509_v3  ;;  %v827_v20 = vmul.f32 0.2, %v670_v4  ;;  %v518_v21 = vpop.f32.mrf.mxu0  ;;  %v679_v22 = vpop.f32.mrf.mxu1  ;;  %v515_v25 = vadd.f32 %v514_v15, %v1682_v43  ;;  %v676_v26 = vadd.f32 %v675_v16, %v1684_v44 }
 0x15b   : > { %vm764_vm8 = vcmp.ge.f32.partialorder %v513_v9, 0.0  ;;  %vm766_vm9 = vcmp.ge.f32.partialorder %v674_v10, 0.0  ;;  %1016 = vst [vmem:[%s1693_s22 + $0x20] sm:$0xff] %v952_v17  ;;  %1018 = vst [vmem:[%s1693_s22 + $0x30] sm:$0xff] %v954_v18  ;;  %v828_v23 = vmul.f32 0.2, %v513_v9  ;;  %v519_v29 = vadd.f32 %v518_v21, %v1678_v39 }
 0x15c   : > { %v830_v24 = vmul.f32 0.2, %v674_v10  ;;  %v889_v27 = vsel %vm761_vm6, %v509_v3, %v825_v19  ;;  %v891_v28 = vsel %vm763_vm7, %v670_v4, %v827_v20  ;;  %v680_v30 = vadd.f32 %v679_v22, %v1680_v40  ;;  %v520_v31 = vpop.f32.mrf.mxu0  ;;  %v681_v32 = vpop.f32.mrf.mxu1 }
 0x15d   : > { %v953_v33 = vmul.f32 1.4142135, %v889_v27  ;;  %v955_v34 = vmul.f32 1.4142135, %v891_v28  ;;  %v892_v35 = vsel %vm764_vm8, %v513_v9, %v828_v23  ;;  %vm765_vm10 = vcmp.ge.f32.partialorder %v515_v25, 0.0 }
 0x15e   : > { %v894_v36 = vsel %vm766_vm9, %v674_v10, %v830_v24  ;;  %v956_v37 = vmul.f32 1.4142135, %v892_v35  ;;  %vm767_vm11 = vcmp.ge.f32.partialorder %v676_v26, 0.0  ;;  %v524_v41 = vpop.f32.mrf.mxu0  ;;  %v685_v42 = vpop.f32.mrf.mxu1  ;;  %v829_v45 = vmul.f32 0.2, %v515_v25 }
 0x15f   : > { %v958_v38 = vmul.f32 1.4142135, %v894_v36  ;;  %1017 = vst [vmem:[%s1693_s22 + $0x28] sm:$0xff] %v953_v33  ;;  %1019 = vst [vmem:[%s1693_s22 + $0x38] sm:$0xff] %v955_v34  ;;  %v831_v46 = vmul.f32 0.2, %v676_v26  ;;  %v521_v49 = vadd.f32 %v520_v31, %v1682_v43  ;;  %v682_v50 = vadd.f32 %v681_v32, %v1684_v44 }
 0x160   : > { %vm768_vm12 = vcmp.ge.f32.partialorder %v519_v29, 0.0  ;;  %vm770_vm13 = vcmp.ge.f32.partialorder %v680_v30, 0.0  ;;  %1020 = vst [vmem:[%s1693_s22 + $0x40] sm:$0xff] %v956_v37  ;;  %v832_v47 = vmul.f32 0.2, %v519_v29  ;;  %v526_v51 = vpop.f32.mrf.mxu0  ;;  %v687_v52 = vpop.f32.mrf.mxu1  ;;  %v893_v53 = vsel %vm765_vm10, %v515_v25, %v829_v45 }
 0x161   : > { %1022 = vst [vmem:[%s1693_s22 + $0x50] sm:$0xff] %v958_v38  ;;  %v834_v48 = vmul.f32 0.2, %v680_v30  ;;  %v895_v54 = vsel %vm767_vm11, %v676_v26, %v831_v46  ;;  %v525_v55 = vadd.f32 %v524_v41, %v1678_v39  ;;  %v686_v56 = vadd.f32 %v685_v42, %v1680_v40 }
 0x162   : > { %v957_v57 = vmul.f32 1.4142135, %v893_v53  ;;  %v959_v58 = vmul.f32 1.4142135, %v895_v54  ;;  %v896_v59 = vsel %vm768_vm12, %v519_v29, %v832_v47  ;;  %v530_v61 = vpop.f32.mrf.mxu0  ;;  %v691_v62 = vpop.f32.mrf.mxu1  ;;  %vm769_vm14 = vcmp.ge.f32.partialorder %v521_v49, 0.0 }
 0x163   : > { %v898_v60 = vsel %vm770_vm13, %v680_v30, %v834_v48  ;;  %v960_v63 = vmul.f32 1.4142135, %v896_v59  ;;  %vm771_vm15 = vcmp.ge.f32.partialorder %v682_v50, 0.0  ;;  %v833_v1 = vmul.f32 0.2, %v521_v49 }
 0x164   : > { %v962_v0 = vmul.f32 1.4142135, %v898_v60  ;;  %1021 = vst [vmem:[%s1693_s22 + $0x48] sm:$0xff] %v957_v57  ;;  %1023 = vst [vmem:[%s1693_s22 + $0x58] sm:$0xff] %v959_v58  ;;  %v835_v2 = vmul.f32 0.2, %v682_v50  ;;  %v532_v3 = vpop.f32.mrf.mxu0  ;;  %v693_v4 = vpop.f32.mrf.mxu1  ;;  %v527_v7 = vadd.f32 %v526_v51, %v1682_v43  ;;  %v688_v8 = vadd.f32 %v687_v52, %v1684_v44 }
 0x165   : > { %vm772_vm0 = vcmp.ge.f32.partialorder %v525_v55, 0.0  ;;  %vm774_vm1 = vcmp.ge.f32.partialorder %v686_v56, 0.0  ;;  %1024 = vst [vmem:[%s1693_s22 + $0x60] sm:$0xff] %v960_v63  ;;  %v836_v5 = vmul.f32 0.2, %v525_v55  ;;  %v897_v9 = vsel %vm769_vm14, %v521_v49, %v833_v1 }
 0x166   : > { %1026 = vst [vmem:[%s1693_s22 + $0x70] sm:$0xff] %v962_v0  ;;  %v838_v6 = vmul.f32 0.2, %v686_v56  ;;  %v899_v10 = vsel %vm771_vm15, %v682_v50, %v835_v2  ;;  %v531_v11 = vadd.f32 %v530_v61, %v1678_v39  ;;  %v692_v12 = vadd.f32 %v691_v62, %v1680_v40  ;;  %v536_v13 = vpop.f32.mrf.mxu0  ;;  %v697_v14 = vpop.f32.mrf.mxu1 }
 0x167   : > { %v961_v15 = vmul.f32 1.4142135, %v897_v9  ;;  %v963_v16 = vmul.f32 1.4142135, %v899_v10  ;;  %v900_v17 = vsel %vm772_vm0, %v525_v55, %v836_v5  ;;  %vm773_vm2 = vcmp.ge.f32.partialorder %v527_v7, 0.0 }
 0x168   : > { %v902_v18 = vsel %vm774_vm1, %v686_v56, %v838_v6  ;;  %v964_v19 = vmul.f32 1.4142135, %v900_v17  ;;  %vm775_vm3 = vcmp.ge.f32.partialorder %v688_v8, 0.0  ;;  %v538_v21 = vpop.f32.mrf.mxu0  ;;  %v699_v22 = vpop.f32.mrf.mxu1  ;;  %v837_v23 = vmul.f32 0.2, %v527_v7 }
 0x169   : > { %v966_v20 = vmul.f32 1.4142135, %v902_v18  ;;  %1025 = vst [vmem:[%s1693_s22 + $0x68] sm:$0xff] %v961_v15  ;;  %1027 = vst [vmem:[%s1693_s22 + $0x78] sm:$0xff] %v963_v16  ;;  %v839_v24 = vmul.f32 0.2, %v688_v8  ;;  %v533_v27 = vadd.f32 %v532_v3, %v1682_v43  ;;  %v694_v28 = vadd.f32 %v693_v4, %v1684_v44 }
 0x16a   : > { %vm776_vm4 = vcmp.ge.f32.partialorder %v531_v11, 0.0  ;;  %vm778_vm5 = vcmp.ge.f32.partialorder %v692_v12, 0.0  ;;  %1028 = vst [vmem:[%s1693_s22 + $0x80] sm:$0xff] %v964_v19  ;;  %v840_v25 = vmul.f32 0.2, %v531_v11  ;;  %v542_v29 = vpop.f32.mrf.mxu0  ;;  %v703_v30 = vpop.f32.mrf.mxu1  ;;  %v901_v31 = vsel %vm773_vm2, %v527_v7, %v837_v23 }
 0x16b   : > { %1030 = vst [vmem:[%s1693_s22 + $0x90] sm:$0xff] %v966_v20  ;;  %v842_v26 = vmul.f32 0.2, %v692_v12  ;;  %v903_v32 = vsel %vm775_vm3, %v688_v8, %v839_v24  ;;  %v537_v33 = vadd.f32 %v536_v13, %v1678_v39  ;;  %v698_v34 = vadd.f32 %v697_v14, %v1680_v40 }
 0x16c   : > { %v965_v35 = vmul.f32 1.4142135, %v901_v31  ;;  %v967_v36 = vmul.f32 1.4142135, %v903_v32  ;;  %v904_v37 = vsel %vm776_vm4, %v531_v11, %v840_v25  ;;  %v544_v41 = vpop.f32.mrf.mxu0  ;;  %v705_v42 = vpop.f32.mrf.mxu1  ;;  %vm777_vm6 = vcmp.ge.f32.partialorder %v533_v27, 0.0 }
 0x16d   : > { %v906_v38 = vsel %vm778_vm5, %v692_v12, %v842_v26  ;;  %v968_v45 = vmul.f32 1.4142135, %v904_v37  ;;  %vm779_vm7 = vcmp.ge.f32.partialorder %v694_v28, 0.0  ;;  %v841_v47 = vmul.f32 0.2, %v533_v27 }
 0x16e   : > { %v970_v46 = vmul.f32 1.4142135, %v906_v38  ;;  %1029 = vst [vmem:[%s1693_s22 + $0x88] sm:$0xff] %v965_v35  ;;  %1031 = vst [vmem:[%s1693_s22 + $0x98] sm:$0xff] %v967_v36  ;;  %v843_v48 = vmul.f32 0.2, %v694_v28  ;;  %v548_v49 = vpop.f32.mrf.mxu0  ;;  %v709_v50 = vpop.f32.mrf.mxu1  ;;  %v539_v53 = vadd.f32 %v538_v21, %v1682_v43  ;;  %v700_v54 = vadd.f32 %v699_v22, %v1684_v44 }
 0x16f   : > { %vm780_vm8 = vcmp.ge.f32.partialorder %v537_v33, 0.0  ;;  %vm782_vm9 = vcmp.ge.f32.partialorder %v698_v34, 0.0  ;;  %1032 = vst [vmem:[%s1693_s22 + $0xa0] sm:$0xff] %v968_v45  ;;  %v844_v51 = vmul.f32 0.2, %v537_v33  ;;  %v905_v55 = vsel %vm777_vm6, %v533_v27, %v841_v47 }
 0x170   : > { %1034 = vst [vmem:[%s1693_s22 + $0xb0] sm:$0xff] %v970_v46  ;;  %v846_v52 = vmul.f32 0.2, %v698_v34  ;;  %v907_v56 = vsel %vm779_vm7, %v694_v28, %v843_v48  ;;  %v543_v57 = vadd.f32 %v542_v29, %v1678_v39  ;;  %v704_v58 = vadd.f32 %v703_v30, %v1680_v40  ;;  %v550_v59 = vpop.f32.mrf.mxu0  ;;  %v711_v60 = vpop.f32.mrf.mxu1 }
 0x171   : > { %v969_v61 = vmul.f32 1.4142135, %v905_v55  ;;  %v971_v62 = vmul.f32 1.4142135, %v907_v56  ;;  %v908_v63 = vsel %vm780_vm8, %v537_v33, %v844_v51  ;;  %vm781_vm10 = vcmp.ge.f32.partialorder %v539_v53, 0.0 }
 0x172   : > { %v910_v0 = vsel %vm782_vm9, %v698_v34, %v846_v52  ;;  %v972_v1 = vmul.f32 1.4142135, %v908_v63  ;;  %vm783_vm11 = vcmp.ge.f32.partialorder %v700_v54, 0.0  ;;  %v554_v3 = vpop.f32.mrf.mxu0  ;;  %v715_v4 = vpop.f32.mrf.mxu1  ;;  %v845_v5 = vmul.f32 0.2, %v539_v53 }
 0x173   : > { %v974_v2 = vmul.f32 1.4142135, %v910_v0  ;;  %1033 = vst [vmem:[%s1693_s22 + $0xa8] sm:$0xff] %v969_v61  ;;  %1035 = vst [vmem:[%s1693_s22 + $0xb8] sm:$0xff] %v971_v62  ;;  %v847_v6 = vmul.f32 0.2, %v700_v54  ;;  %v545_v9 = vadd.f32 %v544_v41, %v1682_v43  ;;  %v706_v10 = vadd.f32 %v705_v42, %v1684_v44 }
 0x174   : > { %vm784_vm12 = vcmp.ge.f32.partialorder %v543_v57, 0.0  ;;  %vm786_vm13 = vcmp.ge.f32.partialorder %v704_v58, 0.0  ;;  %1036 = vst [vmem:[%s1693_s22 + $0xc0] sm:$0xff] %v972_v1  ;;  %v848_v7 = vmul.f32 0.2, %v543_v57  ;;  %v556_v11 = vpop.f32.mrf.mxu0  ;;  %v717_v12 = vpop.f32.mrf.mxu1  ;;  %v909_v13 = vsel %vm781_vm10, %v539_v53, %v845_v5 }
 0x175   : > { %1038 = vst [vmem:[%s1693_s22 + $0xd0] sm:$0xff] %v974_v2  ;;  %v850_v8 = vmul.f32 0.2, %v704_v58  ;;  %v911_v14 = vsel %vm783_vm11, %v700_v54, %v847_v6  ;;  %v549_v15 = vadd.f32 %v548_v49, %v1678_v39  ;;  %v710_v16 = vadd.f32 %v709_v50, %v1680_v40 }
 0x176   : > { %v973_v17 = vmul.f32 1.4142135, %v909_v13  ;;  %v975_v18 = vmul.f32 1.4142135, %v911_v14  ;;  %v912_v19 = vsel %vm784_vm12, %v543_v57, %v848_v7  ;;  %v560_v21 = vpop.f32.mrf.mxu0  ;;  %v721_v22 = vpop.f32.mrf.mxu1  ;;  %vm785_vm14 = vcmp.ge.f32.partialorder %v545_v9, 0.0 }
 0x177   : > { %v914_v20 = vsel %vm786_vm13, %v704_v58, %v850_v8  ;;  %v976_v23 = vmul.f32 1.4142135, %v912_v19  ;;  %vm787_vm15 = vcmp.ge.f32.partialorder %v706_v10, 0.0  ;;  %v849_v25 = vmul.f32 0.2, %v545_v9 }
 0x178   : > { %v978_v24 = vmul.f32 1.4142135, %v914_v20  ;;  %1037 = vst [vmem:[%s1693_s22 + $0xc8] sm:$0xff] %v973_v17  ;;  %1039 = vst [vmem:[%s1693_s22 + $0xd8] sm:$0xff] %v975_v18  ;;  %v851_v26 = vmul.f32 0.2, %v706_v10  ;;  %v562_v27 = vpop.f32.mrf.mxu0  ;;  %v723_v28 = vpop.f32.mrf.mxu1  ;;  %v551_v31 = vadd.f32 %v550_v59, %v1682_v43  ;;  %v712_v32 = vadd.f32 %v711_v60, %v1684_v44 }
 0x179   : > { %vm788_vm0 = vcmp.ge.f32.partialorder %v549_v15, 0.0  ;;  %vm790_vm1 = vcmp.ge.f32.partialorder %v710_v16, 0.0  ;;  %1040 = vst [vmem:[%s1693_s22 + $0xe0] sm:$0xff] %v976_v23  ;;  %v852_v29 = vmul.f32 0.2, %v549_v15  ;;  %v913_v33 = vsel %vm785_vm14, %v545_v9, %v849_v25 }
 0x17a   : > { %1042 = vst [vmem:[%s1693_s22 + $0xf0] sm:$0xff] %v978_v24  ;;  %v854_v30 = vmul.f32 0.2, %v710_v16  ;;  %v915_v34 = vsel %vm787_vm15, %v706_v10, %v851_v26  ;;  %v555_v35 = vadd.f32 %v554_v3, %v1678_v39  ;;  %v716_v36 = vadd.f32 %v715_v4, %v1680_v40  ;;  %v566_v37 = vpop.f32.mrf.mxu0  ;;  %v727_v38 = vpop.f32.mrf.mxu1 }
 0x17b   : > { %v977_v41 = vmul.f32 1.4142135, %v913_v33  ;;  %v979_v42 = vmul.f32 1.4142135, %v915_v34  ;;  %v916_v45 = vsel %vm788_vm0, %v549_v15, %v852_v29  ;;  %vm789_vm2 = vcmp.ge.f32.partialorder %v551_v31, 0.0 }
 0x17c   : > { %v918_v46 = vsel %vm790_vm1, %v710_v16, %v854_v30  ;;  %v980_v47 = vmul.f32 1.4142135, %v916_v45  ;;  %vm791_vm3 = vcmp.ge.f32.partialorder %v712_v32, 0.0  ;;  %v1789_v49 = vpop.f32.mrf.mxu0  ;;  %v1791_v50 = vpop.f32.mrf.mxu1  ;;  %v853_v51 = vmul.f32 0.2, %v551_v31 }
 0x17d   : > { %v982_v48 = vmul.f32 1.4142135, %v918_v46  ;;  %1041 = vst [vmem:[%s1693_s22 + $0xe8] sm:$0xff] %v977_v41  ;;  %1043 = vst [vmem:[%s1693_s22 + $0xf8] sm:$0xff] %v979_v42  ;;  %v855_v52 = vmul.f32 0.2, %v712_v32  ;;  %v557_v55 = vadd.f32 %v556_v11, %v1682_v43  ;;  %v718_v56 = vadd.f32 %v717_v12, %v1684_v44 }
 0x17e   : > { %vm792_vm4 = vcmp.ge.f32.partialorder %v555_v35, 0.0  ;;  %vm794_vm5 = vcmp.ge.f32.partialorder %v716_v36, 0.0  ;;  %1044 = vst [vmem:[%s1693_s22 + $0x100] sm:$0xff] %v980_v47  ;;  %v856_v53 = vmul.f32 0.2, %v555_v35  ;;  %v572_v57 = vpop.f32.mrf.mxu0  ;;  %v733_v58 = vpop.f32.mrf.mxu1  ;;  %v917_v59 = vsel %vm789_vm2, %v551_v31, %v853_v51 }
 0x17f   : > { %1046 = vst [vmem:[%s1693_s22 + $0x110] sm:$0xff] %v982_v48  ;;  %v858_v54 = vmul.f32 0.2, %v716_v36  ;;  %v919_v60 = vsel %vm791_vm3, %v712_v32, %v855_v52  ;;  %v561_v61 = vadd.f32 %v560_v21, %v1678_v39  ;;  %v722_v62 = vadd.f32 %v721_v22, %v1680_v40 }
 0x180   : > { %v981_v63 = vmul.f32 1.4142135, %v917_v59  ;;  %v983_v0 = vmul.f32 1.4142135, %v919_v60  ;;  %v920_v1 = vsel %vm792_vm4, %v555_v35, %v856_v53  ;;  %vm793_vm6 = vcmp.ge.f32.partialorder %v557_v55, 0.0  ;;  %v1805_v5 = vpop.f32.mrf.mxu0  ;;  %v1807_v6 = vpop.f32.mrf.mxu1 }
 0x181   : > { %v922_v2 = vsel %vm794_vm5, %v716_v36, %v858_v54  ;;  %v984_v3 = vmul.f32 1.4142135, %v920_v1  ;;  %vm795_vm7 = vcmp.ge.f32.partialorder %v718_v56, 0.0  ;;  %v857_v7 = vmul.f32 0.2, %v557_v55 }
 0x182   : > { %v986_v4 = vmul.f32 1.4142135, %v922_v2  ;;  %1045 = vst [vmem:[%s1693_s22 + $0x108] sm:$0xff] %v981_v63  ;;  %1047 = vst [vmem:[%s1693_s22 + $0x118] sm:$0xff] %v983_v0  ;;  %v859_v8 = vmul.f32 0.2, %v718_v56  ;;  %v563_v11 = vadd.f32 %v562_v27, %v1682_v43  ;;  %v724_v12 = vadd.f32 %v723_v28, %v1684_v44  ;;  %v578_v21 = vpop.f32.mrf.mxu0  ;;  %v739_v22 = vpop.f32.mrf.mxu1 }
 0x183   : > { %vm796_vm8 = vcmp.ge.f32.partialorder %v561_v61, 0.0  ;;  %vm798_vm9 = vcmp.ge.f32.partialorder %v722_v62, 0.0  ;;  %1048 = vst [vmem:[%s1693_s22 + $0x120] sm:$0xff] %v984_v3  ;;  %v860_v9 = vmul.f32 0.2, %v561_v61  ;;  %v921_v13 = vsel %vm793_vm6, %v557_v55, %v857_v7 }
 0x184   : > { %1050 = vst [vmem:[%s1693_s22 + $0x130] sm:$0xff] %v986_v4  ;;  %v862_v10 = vmul.f32 0.2, %v722_v62  ;;  %v923_v14 = vsel %vm795_vm7, %v718_v56, %v859_v8  ;;  %v567_v15 = vadd.f32 %v566_v37, %v1678_v39  ;;  %v728_v16 = vadd.f32 %v727_v38, %v1680_v40  ;;  %v580_v35 = vpop.f32.mrf.mxu0  ;;  %v741_v36 = vpop.f32.mrf.mxu1 }
 0x185   : > { %v985_v17 = vmul.f32 1.4142135, %v921_v13  ;;  %v987_v18 = vmul.f32 1.4142135, %v923_v14  ;;  %v924_v19 = vsel %vm796_vm8, %v561_v61, %v860_v9  ;;  %vm797_vm10 = vcmp.ge.f32.partialorder %v563_v11, 0.0 }
 0x186   : > { %v926_v20 = vsel %vm798_vm9, %v722_v62, %v862_v10  ;;  %v988_v23 = vmul.f32 1.4142135, %v924_v19  ;;  %vm799_vm11 = vcmp.ge.f32.partialorder %v724_v12, 0.0  ;;  %v861_v25 = vmul.f32 0.2, %v563_v11  ;;  %v584_v53 = vpop.f32.mrf.mxu0  ;;  %v745_v54 = vpop.f32.mrf.mxu1 }
 0x187   : > { %v990_v24 = vmul.f32 1.4142135, %v926_v20  ;;  %1049 = vst [vmem:[%s1693_s22 + $0x128] sm:$0xff] %v985_v17  ;;  %1051 = vst [vmem:[%s1693_s22 + $0x138] sm:$0xff] %v987_v18  ;;  %v863_v26 = vmul.f32 0.2, %v724_v12  ;;  %v569_v29 = vadd.f32 %v1789_v49, %v1682_v43  ;;  %v730_v30 = vadd.f32 %v1791_v50, %v1684_v44 }
 0x188   : > { %vm800_vm12 = vcmp.ge.f32.partialorder %v567_v15, 0.0  ;;  %vm802_vm13 = vcmp.ge.f32.partialorder %v728_v16, 0.0  ;;  %1052 = vst [vmem:[%s1693_s22 + $0x140] sm:$0xff] %v988_v23  ;;  %v864_v27 = vmul.f32 0.2, %v567_v15  ;;  %v925_v31 = vsel %vm797_vm10, %v563_v11, %v861_v25  ;;  %v586_v3 = vpop.f32.mrf.mxu0  ;;  %v747_v4 = vpop.f32.mrf.mxu1 }
 0x189   : > { %1054 = vst [vmem:[%s1693_s22 + $0x150] sm:$0xff] %v990_v24  ;;  %v866_v28 = vmul.f32 0.2, %v728_v16  ;;  %v927_v32 = vsel %vm799_vm11, %v724_v12, %v863_v26  ;;  %v573_v33 = vadd.f32 %v572_v57, %v1678_v39  ;;  %v734_v34 = vadd.f32 %v733_v58, %v1680_v40 }
 0x18a   : > { %v989_v37 = vmul.f32 1.4142135, %v925_v31  ;;  %v991_v38 = vmul.f32 1.4142135, %v927_v32  ;;  %v928_v41 = vsel %vm800_vm12, %v567_v15, %v864_v27  ;;  %vm801_vm14 = vcmp.ge.f32.partialorder %v569_v29, 0.0  ;;  %v590_v19 = vpop.f32.mrf.mxu0  ;;  %v751_v20 = vpop.f32.mrf.mxu1 }
 0x18b   : > { %v930_v42 = vsel %vm802_vm13, %v728_v16, %v866_v28  ;;  %v992_v45 = vmul.f32 1.4142135, %v928_v41  ;;  %vm803_vm15 = vcmp.ge.f32.partialorder %v730_v30, 0.0  ;;  %v865_v47 = vmul.f32 0.2, %v569_v29 }
 0x18c   : > { %v994_v46 = vmul.f32 1.4142135, %v930_v42  ;;  %1053 = vst [vmem:[%s1693_s22 + $0x148] sm:$0xff] %v989_v37  ;;  %1055 = vst [vmem:[%s1693_s22 + $0x158] sm:$0xff] %v991_v38  ;;  %v867_v48 = vmul.f32 0.2, %v730_v30  ;;  %v575_v51 = vadd.f32 %v1805_v5, %v1682_v43  ;;  %v736_v52 = vadd.f32 %v1807_v6, %v1684_v44 }
 0x18d   : > { %vm804_vm0 = vcmp.ge.f32.partialorder %v573_v33, 0.0  ;;  %vm806_vm1 = vcmp.ge.f32.partialorder %v734_v34, 0.0  ;;  %1056 = vst [vmem:[%s1693_s22 + $0x160] sm:$0xff] %v992_v45  ;;  %v868_v49 = vmul.f32 0.2, %v573_v33  ;;  %v929_v55 = vsel %vm801_vm14, %v569_v29, %v865_v47 }
 0x18e   : > { %1058 = vst [vmem:[%s1693_s22 + $0x170] sm:$0xff] %v994_v46  ;;  %v870_v50 = vmul.f32 0.2, %v734_v34  ;;  %v931_v56 = vsel %vm803_vm15, %v730_v30, %v867_v48  ;;  %v579_v57 = vadd.f32 %v578_v21, %v1678_v39  ;;  %v740_v58 = vadd.f32 %v739_v22, %v1680_v40 }
 0x18f   : > { %v993_v59 = vmul.f32 1.4142135, %v929_v55  ;;  %v995_v60 = vmul.f32 1.4142135, %v931_v56  ;;  %v932_v61 = vsel %vm804_vm0, %v573_v33, %v868_v49  ;;  %vm805_vm2 = vcmp.ge.f32.partialorder %v575_v51, 0.0 }
 0x190   : > { %v934_v62 = vsel %vm806_vm1, %v734_v34, %v870_v50  ;;  %v996_v63 = vmul.f32 1.4142135, %v932_v61  ;;  %vm807_vm3 = vcmp.ge.f32.partialorder %v736_v52, 0.0  ;;  %v869_v1 = vmul.f32 0.2, %v575_v51 }
 0x191   : > { %v998_v0 = vmul.f32 1.4142135, %v934_v62  ;;  %1057 = vst [vmem:[%s1693_s22 + $0x168] sm:$0xff] %v993_v59  ;;  %1059 = vst [vmem:[%s1693_s22 + $0x178] sm:$0xff] %v995_v60  ;;  %v871_v2 = vmul.f32 0.2, %v736_v52  ;;  %v581_v7 = vadd.f32 %v580_v35, %v1682_v43  ;;  %v742_v8 = vadd.f32 %v741_v36, %v1684_v44  ;;  %v592_v35 = vpop.f32.mrf.mxu0  ;;  %v753_v36 = vpop.f32.mrf.mxu1 }
 0x192   : > { %vm808_vm4 = vcmp.ge.f32.partialorder %v579_v57, 0.0  ;;  %vm810_vm5 = vcmp.ge.f32.partialorder %v740_v58, 0.0  ;;  %1060 = vst [vmem:[%s1693_s22 + $0x180] sm:$0xff] %v996_v63  ;;  %v872_v5 = vmul.f32 0.2, %v579_v57  ;;  %v933_v9 = vsel %vm805_vm2, %v575_v51, %v869_v1 }
 0x193   : > { %1062 = vst [vmem:[%s1693_s22 + $0x190] sm:$0xff] %v998_v0  ;;  %v874_v6 = vmul.f32 0.2, %v740_v58  ;;  %v935_v10 = vsel %vm807_vm3, %v736_v52, %v871_v2  ;;  %v585_v11 = vadd.f32 %v584_v53, %v1678_v39  ;;  %v746_v12 = vadd.f32 %v745_v54, %v1680_v40 }
 0x194   : > { %v997_v13 = vmul.f32 1.4142135, %v933_v9  ;;  %v999_v14 = vmul.f32 1.4142135, %v935_v10  ;;  %v936_v15 = vsel %vm808_vm4, %v579_v57, %v872_v5  ;;  %vm809_vm6 = vcmp.ge.f32.partialorder %v581_v7, 0.0 }
 0x195   : > { %v938_v16 = vsel %vm810_vm5, %v740_v58, %v874_v6  ;;  %v1000_v17 = vmul.f32 1.4142135, %v936_v15  ;;  %vm811_vm7 = vcmp.ge.f32.partialorder %v742_v8, 0.0  ;;  %v873_v21 = vmul.f32 0.2, %v581_v7 }
 0x196   : > { %v1002_v18 = vmul.f32 1.4142135, %v938_v16  ;;  %1061 = vst [vmem:[%s1693_s22 + $0x188] sm:$0xff] %v997_v13  ;;  %1063 = vst [vmem:[%s1693_s22 + $0x198] sm:$0xff] %v999_v14  ;;  %v875_v22 = vmul.f32 0.2, %v742_v8  ;;  %v587_v25 = vadd.f32 %v586_v3, %v1682_v43  ;;  %v748_v26 = vadd.f32 %v747_v4, %v1684_v44 }
 0x197   : > { %vm812_vm8 = vcmp.ge.f32.partialorder %v585_v11, 0.0  ;;  %vm814_vm9 = vcmp.ge.f32.partialorder %v746_v12, 0.0  ;;  %1064 = vst [vmem:[%s1693_s22 + $0x1a0] sm:$0xff] %v1000_v17  ;;  %v876_v23 = vmul.f32 0.2, %v585_v11  ;;  %v937_v27 = vsel %vm809_vm6, %v581_v7, %v873_v21 }
 0x198   : > { %1066 = vst [vmem:[%s1693_s22 + $0x1b0] sm:$0xff] %v1002_v18  ;;  %v878_v24 = vmul.f32 0.2, %v746_v12  ;;  %v939_v28 = vsel %vm811_vm7, %v742_v8, %v875_v22  ;;  %v591_v29 = vadd.f32 %v590_v19, %v1678_v39  ;;  %v752_v30 = vadd.f32 %v751_v20, %v1680_v40 }
 0x199   : > { %v1001_v31 = vmul.f32 1.4142135, %v937_v27  ;;  %v1003_v32 = vmul.f32 1.4142135, %v939_v28  ;;  %v940_v33 = vsel %vm812_vm8, %v585_v11, %v876_v23  ;;  %vm813_vm10 = vcmp.ge.f32.partialorder %v587_v25, 0.0 }
 0x19a   : > { %v942_v34 = vsel %vm814_vm9, %v746_v12, %v878_v24  ;;  %v1004_v37 = vmul.f32 1.4142135, %v940_v33  ;;  %vm815_vm11 = vcmp.ge.f32.partialorder %v748_v26, 0.0  ;;  %v877_v41 = vmul.f32 0.2, %v587_v25 }
 0x19b   : > { %v1006_v38 = vmul.f32 1.4142135, %v942_v34  ;;  %1065 = vst [vmem:[%s1693_s22 + $0x1a8] sm:$0xff] %v1001_v31  ;;  %1067 = vst [vmem:[%s1693_s22 + $0x1b8] sm:$0xff] %v1003_v32  ;;  %v879_v42 = vmul.f32 0.2, %v748_v26  ;;  %v593_v45 = vadd.f32 %v592_v35, %v1682_v43  ;;  %v754_v46 = vadd.f32 %v753_v36, %v1684_v44 }
 0x19c   : > { %vm816_vm12 = vcmp.ge.f32.partialorder %v591_v29, 0.0  ;;  %vm818_vm13 = vcmp.ge.f32.partialorder %v752_v30, 0.0  ;;  %1068 = vst [vmem:[%s1693_s22 + $0x1c0] sm:$0xff] %v1004_v37  ;;  %v880_v39 = vmul.f32 0.2, %v591_v29  ;;  %v941_v47 = vsel %vm813_vm10, %v587_v25, %v877_v41 }
 0x19d   : > { %1070 = vst [vmem:[%s1693_s22 + $0x1d0] sm:$0xff] %v1006_v38  ;;  %v882_v40 = vmul.f32 0.2, %v752_v30  ;;  %v943_v48 = vsel %vm815_vm11, %v748_v26, %v879_v42  ;;  %v1005_v49 = vmul.f32 1.4142135, %v941_v47  ;;  %vm817_vm14 = vcmp.ge.f32.partialorder %v593_v45, 0.0 }
 0x19e   : > { %v1007_v50 = vmul.f32 1.4142135, %v943_v48  ;;  %v944_v51 = vsel %vm816_vm12, %v591_v29, %v880_v39  ;;  %vm819_vm15 = vcmp.ge.f32.partialorder %v754_v46, 0.0  ;;  %v881_v43 = vmul.f32 0.2, %v593_v45 }
 0x19f   : > { %v946_v52 = vsel %vm818_vm13, %v752_v30, %v882_v40  ;;  %v1008_v53 = vmul.f32 1.4142135, %v944_v51  ;;  %1069 = vst [vmem:[%s1693_s22 + $0x1c8] sm:$0xff] %v1005_v49  ;;  %v883_v44 = vmul.f32 0.2, %v754_v46 }
 0x1a0   : > { %v1010_v54 = vmul.f32 1.4142135, %v946_v52  ;;  %1071 = vst [vmem:[%s1693_s22 + $0x1d8] sm:$0xff] %v1007_v50  ;;  %v945_v55 = vsel %vm817_vm14, %v593_v45, %v881_v43 }
 0x1a1   : > { %1072 = vst [vmem:[%s1693_s22 + $0x1e0] sm:$0xff] %v1008_v53  ;;  %v947_v56 = vsel %vm819_vm15, %v754_v46, %v883_v44  ;;  %v1009_v57 = vmul.f32 1.4142135, %v945_v55 }
 0x1a2   : > { %1074 = vst [vmem:[%s1693_s22 + $0x1f0] sm:$0xff] %v1010_v54  ;;  %v1011_v58 = vmul.f32 1.4142135, %v947_v56 }
 0x1a3   : > { %1073 = vst [vmem:[%s1693_s22 + $0x1e8] sm:$0xff] %v1009_v57 }
 0x1a4   : > { %1075 = vst [vmem:[%s1693_s22 + $0x1f8] sm:$0xff] %v1011_v58 }
 0x1a5   : > { %1407 = shalt.err (!%p1404_p5)
}
 0x1a6   : > { %s1408_s27 = scalar_lea.hbm %s1882_s15, 8192  ;;  %s1412_s4 = scalar_lea.hbm %s1937_s3, 16384 }
 0x1a7   : > { %p1409_p10 = scmp.ne.s32.totalorder %s1882_s15, %s1408_s27  ;;  %p1413_p6 = scmp.lt.s32.totalorder %s1882_s15, %s1937_s3 }
 0x1a8   : > { %p1414_p12 = scmp.lt.s32.totalorder %s1412_s4, %s1408_s27 }
 0x1a9   : > { %p1410_p1 = pnand %p1409_p10, %p1605_p7 }
 0x1aa   : > { %p1415_p3 = por %p1414_p12, %p1413_p6 }
 0x1ab   : > { %p1411_p4 = pneg %p1410_p1 }
 0x1ad   : > { %p1416_p8 = pnand %p1415_p3, %p1411_p4 }
 0x1af   : > { %1419 = shalt.err (!%p1416_p8)
}
 0x1b0   : > { %s1488_s22 = smov 512   ;;  %s1489_s24 = smov 32  }
 0x1b1   : > { %1235 = dma.vmem_to_hbm [thread:$0]  (%p1605_p7), %s1884_s5, 8192, %s1882_s15, %s1077_s8, %s1488_s22, %s1488_s22, %s1489_s24  }
 0x1b2 PF: > { %s1108_s7 = sand.u32 1, %s1458_s12   ;;  %p1951_p9 = scmp.ne.s32.totalorder %s1944_s23, 0 }
 0x1b3   : > { %p1952_p11 = scmp.ge.s32.totalorder %s1478_s17, 2  ;;  %s1109_s21 = scalar_lea.sflag [#allocation4], %s1108_s7 }
 0x1b5   : > { %p1249_p2 = pnand %p1952_p11, %p1951_p9 }
 0x1b7   : > { %p1250_p13 = pneg %p1249_p2 }
 0x1b9   : > { %1453 = dma.done.wait (%p1250_p13), %s1109_s21, 8192  }
 0x1ba   : > { %1455 = vsyncadd (%p1250_p13), %s1109_s21, 4294959104  ;;  %s20_s17 = sadd.s32 1, %s1478_s17   ;;  %s1953_s12 = smov %s1462_s13 }
 0x1bb   : > { %p17_p0 = scmp.ge.s32.totalorder %s20_s17, 4   ;;  %s1954_s13 = smov %s1466_s14 }
 0x1bc   : > { %s1955_s14 = smov %s1614_s29  ;;  %s1956_s15 = smov %s1474_s16 }
 0x1bd   : > { %s1957_s16 = smov %s1959_s11  ;;  %19 = sbr.rel (!%p17_p0) target bundleno = 7 (0x7), region = 87 }
 0x1c2   :  { %1114 = vsyncpa [#allocation3], 1 }
 0x1c3   :  { %1116 = vsyncpa [#allocation3 + $0x1], 1 }
 0x1c4   :  { %1117 = vsyncpa [#allocation6], 1 }
 0x1c5   :  { %1118 = vsyncpa [#allocation4], 1 }
 0x1c6   :  { %1120 = vsyncpa [#allocation4 + $0x1], 1 }

</bundles_post_ra>
